<compile_context>
chip_gen: v7x
topology: tpu7x:2x2x1
jax: 0.10.0
libtpu: 0.0.40
codegen_flags: <defaults>
</compile_context>

<pallas_src>
import functools

import jax
import jax.numpy as jnp
from jax.experimental import pallas as pl
from jax.experimental.pallas import tpu as pltpu

EPS = 1e-5
N_MEMBERS = 44
N_CHANNELS = 31

# Lanes per pixel tile (sweepable 4096-16384; keep a multiple of 512).
# TN=8192 f32: x tile ~1.0 MiB + out tile ~1.4 MiB, double-buffered ~5 MiB —
# well under the default scoped VMEM limit on every generation.
_MAX_TILE_N = 8192
# Target minimum output lanes of work per grid step (batch folding for small
# images), and a cap on how far the in-kernel batch loop unrolls.
_MIN_LANES_PER_STEP = 2048
_MAX_TILE_B = 8

# Abramowitz & Stegun 4.4.46:  acos(x) ~= sqrt(1-x) * poly(x), 0<=x<=1,
# |error| <= 2e-8;  for x<0 use pi - acos(-x).
_ACOS_COEFFS = (
    1.5707963050, -0.2145988016, 0.0889789874, -0.0501743046,
    0.0308918810, -0.0170881256, 0.0066700901, -0.0012624911,
)


def _fast_acos(x):
    """Cheap acos: degree-7 minimax poly (VALU) + one sqrt (EUP). |err|<=2e-8."""
    a = jnp.abs(x)
    p = _ACOS_COEFFS[7]
    for c in reversed(_ACOS_COEFFS[:7]):
        p = p * a + c
    r = jnp.sqrt(1.0 - a) * p
    return jnp.where(x < 0.0, jnp.pi - r, r)


def _sam_kernel(x_ref, mn_ref, o_ref, *, eps):
    """One (batch-tile, pixel-tile) block per grid step.

    x_ref : (TB, C, TN)  pixel spectra, channels on sublanes, pixels on lanes
    mn_ref: (M, C)       row-normalized member spectra (precomputed in wrapper)
    o_ref : (TB, M, TN)  output angles (-acos of clipped cosine similarity)
    """
    mn = mn_ref[...]                                    # (M, C) f32, normalized
    tb = x_ref.shape[0]
    for bi in range(tb):                                # static, small (<= 8)
        x = x_ref[bi]                                   # (C, TN) f32

        # Per-pixel norm: sublane reduction -> lane-dense (1, TN); one exact
        # reciprocal per pixel (keeps parity with the torch eps semantics).
        sumsq = jnp.sum(x * x, axis=0, keepdims=True)           # (1, TN)
        inv_pix = pl.reciprocal(jnp.sqrt(sumsq) + eps, approx=False)

        # Cosine numerator on the MXU: (M, C) x (C, TN) -> (M, TN).
        dots = jnp.dot(mn, x, preferred_element_type=jnp.float32)

        cos = jnp.clip(dots * inv_pix, -1.0 + eps, 1.0 - eps)
        o_ref[bi] = -_fast_acos(cos)


def _choose_tiles(b, n):
    """Pick (TB, TN) block sizes over the (batch, pixel) axes."""
    if n > _MAX_TILE_N:
        # Large images: fixed lane-dense tile, ragged last block (OOB writes
        # dropped by Pallas; garbage lanes stay finite and never cross lanes).
        return 1, _MAX_TILE_N
    tn = n  # block dim == array dim is always legal, even if not 128-aligned
    tb = max(1, min(b, _MIN_LANES_PER_STEP // max(n, 1), _MAX_TILE_B))
    # v7x megacore insurance: when b == 1 and everything fits in one tile,
    # split N so both TensorCores get work (only if each half is still big).
    if b == 1 and pl.cdiv(n, tn) < 2 and n >= 2 * _MIN_LANES_PER_STEP:
        half = ((pl.cdiv(n, 2) + 127) // 128) * 128
        if half < n:
            tn = half
    return tb, tn


def spectral_feature_mapper(data, members, eps=EPS):
    """data: (B, C, H, W) float32, members: (M, C) float32 -> (B, M, H, W)."""
    b, c, h, w = data.shape
    m, c2 = members.shape
    assert c == c2, f"channel mismatch: data has {c}, members expect {c2}"
    n = h * w
    eps = float(eps)

    # Hoisted member normalization (done once, outside the grid).
    members = members.astype(jnp.float32)
    m_norm = jnp.sqrt(jnp.sum(members * members, axis=1, keepdims=True))
    mn = members / (m_norm + eps)                                   # (M, C)

    # Free layout glue: NCHW -> (B, C, N).  No transpose.
    x_cn = data.reshape(b, c, n).astype(jnp.float32)

    tb, tn = _choose_tiles(b, n)
    grid = (pl.cdiv(b, tb), pl.cdiv(n, tn))

    out = pl.pallas_call(
        functools.partial(_sam_kernel, eps=eps),
        out_shape=jax.ShapeDtypeStruct((b, m, n), jnp.float32),
        grid_spec=pltpu.PrefetchScalarGridSpec(
            num_scalar_prefetch=0,
            grid=grid,
            in_specs=[
                pl.BlockSpec((tb, c, tn), lambda i, j: (i, 0, j)),
                pl.BlockSpec((m, c), lambda i, j: (0, 0)),
            ],
            out_specs=pl.BlockSpec((tb, m, tn), lambda i, j: (i, 0, j)),
        ),
        compiler_params=pltpu.CompilerParams(
            dimension_semantics=("parallel", "parallel"),
            vmem_limit_bytes=32 * 1024 * 1024,
        ),
    )(x_cn, mn)

    # Glue: (B, M, N) -> (B, M, H, W)  (matches torch .view(batch, -1, H, W)).
    return out.reshape(b, m, h, w)


def _reference(data, members, eps=EPS):
    """Pure-JAX reference mirroring the PyTorch forward."""
    mn = members / (jnp.sqrt(jnp.einsum('ij,ij->i', members, members))[:, None]
                    + eps)
    b, c, h, w = data.shape
    d = jnp.transpose(data.reshape(b, c, h * w), (0, 2, 1))          # (B, N, C)
    norms = jnp.sqrt(jnp.einsum('bij,bij->bi', d, d)) + eps          # (B, N)
    dots = jnp.einsum('bij,mj->bim', d, mn)                          # (B, N, M)
    dots = jnp.clip(dots / norms[:, :, None], -1 + eps, 1 - eps)
    angles = -jnp.arccos(dots)                                       # (B, N, M)
    return jnp.transpose(angles, (0, 2, 1)).reshape(b, -1, h, w)


if __name__ == "__main__":
    key = jax.random.PRNGKey(0)
    k_data, k_members = jax.random.split(key)

    # Deterministic "torch.rand(44, 31)"-style parameter init (uniform [0,1)).
    members = jax.random.uniform(k_members, (N_MEMBERS, N_CHANNELS),
                                 dtype=jnp.float32)

    # Small example input consistent with the module (channels must be 31).
    batch, height, width = 2, 16, 16
    x = jax.random.normal(k_data, (batch, N_CHANNELS, height, width),
                          dtype=jnp.float32)

    out = spectral_feature_mapper(x, members)
    out = jax.block_until_ready(out)

    ref = _reference(x, members)
    assert out.shape == (batch, N_MEMBERS, height, width), out.shape
    assert jnp.allclose(out, ref, atol=1e-4, rtol=1e-4), "mismatch vs reference"

    print("KERNEL_OK")
</pallas_src>

<mosaic_0001>
module attributes {stable_mosaic.version = 11 : i64} {
  func.func @_sam_kernel(%arg0: i32, %arg1: i32, %arg2: memref<2x31x256xf32, #tpu.memory_space<vmem>>, %arg3: memref<44x31xf32, #tpu.memory_space<vmem>>, %arg4: memref<2x44x256xf32, #tpu.memory_space<vmem>>) attributes {dimension_semantics = [#tpu.dimension_semantics<parallel>, #tpu.dimension_semantics<parallel>], iteration_bounds = array<i64: 1, 1>, scalar_prefetch = 0 : i64, scratch_operands = 0 : i64, tpu.core_type = #tpu.core_type<tc>, window_params = [{transform_indices = @transform_0, window_bounds = array<i64: 2, 31, 256>}, {pipeline_mode = #tpu.pipeline_mode<synchronous>, transform_indices = @transform_1, window_bounds = array<i64: 44, 31>}, {transform_indices = @transform_2, window_bounds = array<i64: 2, 44, 256>}]} {
    %c0 = arith.constant 0 : index
    %c0_0 = arith.constant 0 : index
    %0 = vector.load %arg3[%c0, %c0_0] : memref<44x31xf32, #tpu.memory_space<vmem>>, vector<44x31xf32>
    %c0_1 = arith.constant 0 : index
    %c0_2 = arith.constant 0 : index
    %c0_3 = arith.constant 0 : index
    %1 = vector.load %arg2[%c0_1, %c0_2, %c0_3] : memref<2x31x256xf32, #tpu.memory_space<vmem>>, vector<1x31x256xf32>
    %2 = vector.shape_cast %1 : vector<1x31x256xf32> to vector<31x256xf32>
    %3 = arith.mulf %2, %2 : vector<31x256xf32>
    %cst = arith.constant dense<0.000000e+00> : vector<256xf32>
    %4 = vector.multi_reduction <add>, %3, %cst [0] : vector<31x256xf32> to vector<256xf32>
    %5 = vector.shape_cast %4 : vector<256xf32> to vector<1x256xf32>
    %6 = math.sqrt %5 : vector<1x256xf32>
    %cst_4 = arith.constant 9.99999974E-6 : f32
    %7 = vector.broadcast %cst_4 : f32 to vector<1x256xf32>
    %8 = arith.addf %6, %7 : vector<1x256xf32>
    %9 = tpu.reciprocal %8 : vector<1x256xf32> -> vector<1x256xf32>
    %cst_5 = arith.constant dense<0.000000e+00> : vector<44x256xf32>
    %10 = tpu.matmul %0, %2, %cst_5 {dimension_numbers = #tpu.dot_dimension_numbers<[1], [0], [0], [1], [0, 0, 1, 1], [], []>} : vector<44x31xf32>, vector<31x256xf32>, vector<44x256xf32> -> vector<44x256xf32>
    %11 = vector.broadcast %9 : vector<1x256xf32> to vector<44x256xf32>
    %12 = arith.mulf %10, %11 : vector<44x256xf32>
    %cst_6 = arith.constant -0.999989986 : f32
    %cst_7 = arith.constant 0.999989986 : f32
    %13 = vector.broadcast %cst_6 : f32 to vector<44x256xf32>
    %14 = arith.maximumf %13, %12 : vector<44x256xf32>
    %15 = vector.broadcast %cst_7 : f32 to vector<44x256xf32>
    %16 = arith.minimumf %15, %14 : vector<44x256xf32>
    %17 = math.absf %16 : vector<44x256xf32>
    %cst_8 = arith.constant -0.0012624911 : f32
    %18 = vector.broadcast %cst_8 : f32 to vector<44x256xf32>
    %19 = arith.mulf %18, %17 : vector<44x256xf32>
    %cst_9 = arith.constant 6.670090e-03 : f32
    %20 = vector.broadcast %cst_9 : f32 to vector<44x256xf32>
    %21 = arith.addf %19, %20 : vector<44x256xf32>
    %22 = arith.mulf %21, %17 : vector<44x256xf32>
    %cst_10 = arith.constant -0.0170881264 : f32
    %23 = vector.broadcast %cst_10 : f32 to vector<44x256xf32>
    %24 = arith.addf %22, %23 : vector<44x256xf32>
    %25 = arith.mulf %24, %17 : vector<44x256xf32>
    %cst_11 = arith.constant 0.0308918804 : f32
    %26 = vector.broadcast %cst_11 : f32 to vector<44x256xf32>
    %27 = arith.addf %25, %26 : vector<44x256xf32>
    %28 = arith.mulf %27, %17 : vector<44x256xf32>
    %cst_12 = arith.constant -0.0501743034 : f32
    %29 = vector.broadcast %cst_12 : f32 to vector<44x256xf32>
    %30 = arith.addf %28, %29 : vector<44x256xf32>
    %31 = arith.mulf %30, %17 : vector<44x256xf32>
    %cst_13 = arith.constant 0.0889789909 : f32
    %32 = vector.broadcast %cst_13 : f32 to vector<44x256xf32>
    %33 = arith.addf %31, %32 : vector<44x256xf32>
    %34 = arith.mulf %33, %17 : vector<44x256xf32>
    %cst_14 = arith.constant -0.214598805 : f32
    %35 = vector.broadcast %cst_14 : f32 to vector<44x256xf32>
    %36 = arith.addf %34, %35 : vector<44x256xf32>
    %37 = arith.mulf %36, %17 : vector<44x256xf32>
    %cst_15 = arith.constant 1.57079625 : f32
    %38 = vector.broadcast %cst_15 : f32 to vector<44x256xf32>
    %39 = arith.addf %37, %38 : vector<44x256xf32>
    %cst_16 = arith.constant 1.000000e+00 : f32
    %40 = vector.broadcast %cst_16 : f32 to vector<44x256xf32>
    %41 = arith.subf %40, %17 : vector<44x256xf32>
    %42 = math.sqrt %41 : vector<44x256xf32>
    %43 = arith.mulf %42, %39 : vector<44x256xf32>
    %cst_17 = arith.constant 0.000000e+00 : f32
    %44 = vector.broadcast %cst_17 : f32 to vector<44x256xf32>
    %45 = arith.cmpf olt, %16, %44 : vector<44x256xf32>
    %cst_18 = arith.constant 3.14159274 : f32
    %46 = vector.broadcast %cst_18 : f32 to vector<44x256xf32>
    %47 = arith.subf %46, %43 : vector<44x256xf32>
    %48 = arith.select %45, %47, %43 : vector<44x256xi1>, vector<44x256xf32>
    %cst_19 = arith.constant 0.000000e+00 : f32
    %49 = vector.broadcast %cst_19 : f32 to vector<44x256xf32>
    %50 = arith.subf %49, %48 : vector<44x256xf32>
    %c0_20 = arith.constant 0 : index
    %c0_21 = arith.constant 0 : index
    %c0_22 = arith.constant 0 : index
    %51 = vector.load %arg4[%c0_20, %c0_21, %c0_22] : memref<2x44x256xf32, #tpu.memory_space<vmem>>, vector<1x44x256xf32>
    %52 = vector.shape_cast %51 : vector<1x44x256xf32> to vector<44x256xf32>
    %53 = vector.shape_cast %50 : vector<44x256xf32> to vector<1x44x256xf32>
    tpu.vector_store %arg4[%c0_20, %c0_21, %c0_22], %53 {strides = array<i32>} : memref<2x44x256xf32, #tpu.memory_space<vmem>>, vector<1x44x256xf32>,
    %c1 = arith.constant 1 : index
    %c0_23 = arith.constant 0 : index
    %c0_24 = arith.constant 0 : index
    %54 = vector.load %arg2[%c1, %c0_23, %c0_24] : memref<2x31x256xf32, #tpu.memory_space<vmem>>, vector<1x31x256xf32>
    %55 = vector.shape_cast %54 : vector<1x31x256xf32> to vector<31x256xf32>
    %56 = arith.mulf %55, %55 : vector<31x256xf32>
    %cst_25 = arith.constant dense<0.000000e+00> : vector<256xf32>
    %57 = vector.multi_reduction <add>, %56, %cst_25 [0] : vector<31x256xf32> to vector<256xf32>
    %58 = vector.shape_cast %57 : vector<256xf32> to vector<1x256xf32>
    %59 = math.sqrt %58 : vector<1x256xf32>
    %cst_26 = arith.constant 9.99999974E-6 : f32
    %60 = vector.broadcast %cst_26 : f32 to vector<1x256xf32>
    %61 = arith.addf %59, %60 : vector<1x256xf32>
    %62 = tpu.reciprocal %61 : vector<1x256xf32> -> vector<1x256xf32>
    %cst_27 = arith.constant dense<0.000000e+00> : vector<44x256xf32>
    %63 = tpu.matmul %0, %55, %cst_27 {dimension_numbers = #tpu.dot_dimension_numbers<[1], [0], [0], [1], [0, 0, 1, 1], [], []>} : vector<44x31xf32>, vector<31x256xf32>, vector<44x256xf32> -> vector<44x256xf32>
    %64 = vector.broadcast %62 : vector<1x256xf32> to vector<44x256xf32>
    %65 = arith.mulf %63, %64 : vector<44x256xf32>
    %cst_28 = arith.constant -0.999989986 : f32
    %cst_29 = arith.constant 0.999989986 : f32
    %66 = vector.broadcast %cst_28 : f32 to vector<44x256xf32>
    %67 = arith.maximumf %66, %65 : vector<44x256xf32>
    %68 = vector.broadcast %cst_29 : f32 to vector<44x256xf32>
    %69 = arith.minimumf %68, %67 : vector<44x256xf32>
    %70 = math.absf %69 : vector<44x256xf32>
    %cst_30 = arith.constant -0.0012624911 : f32
    %71 = vector.broadcast %cst_30 : f32 to vector<44x256xf32>
    %72 = arith.mulf %71, %70 : vector<44x256xf32>
    %cst_31 = arith.constant 6.670090e-03 : f32
    %73 = vector.broadcast %cst_31 : f32 to vector<44x256xf32>
    %74 = arith.addf %72, %73 : vector<44x256xf32>
    %75 = arith.mulf %74, %70 : vector<44x256xf32>
    %cst_32 = arith.constant -0.0170881264 : f32
    %76 = vector.broadcast %cst_32 : f32 to vector<44x256xf32>
    %77 = arith.addf %75, %76 : vector<44x256xf32>
    %78 = arith.mulf %77, %70 : vector<44x256xf32>
    %cst_33 = arith.constant 0.0308918804 : f32
    %79 = vector.broadcast %cst_33 : f32 to vector<44x256xf32>
    %80 = arith.addf %78, %79 : vector<44x256xf32>
    %81 = arith.mulf %80, %70 : vector<44x256xf32>
    %cst_34 = arith.constant -0.0501743034 : f32
    %82 = vector.broadcast %cst_34 : f32 to vector<44x256xf32>
    %83 = arith.addf %81, %82 : vector<44x256xf32>
    %84 = arith.mulf %83, %70 : vector<44x256xf32>
    %cst_35 = arith.constant 0.0889789909 : f32
    %85 = vector.broadcast %cst_35 : f32 to vector<44x256xf32>
    %86 = arith.addf %84, %85 : vector<44x256xf32>
    %87 = arith.mulf %86, %70 : vector<44x256xf32>
    %cst_36 = arith.constant -0.214598805 : f32
    %88 = vector.broadcast %cst_36 : f32 to vector<44x256xf32>
    %89 = arith.addf %87, %88 : vector<44x256xf32>
    %90 = arith.mulf %89, %70 : vector<44x256xf32>
    %cst_37 = arith.constant 1.57079625 : f32
    %91 = vector.broadcast %cst_37 : f32 to vector<44x256xf32>
    %92 = arith.addf %90, %91 : vector<44x256xf32>
    %cst_38 = arith.constant 1.000000e+00 : f32
    %93 = vector.broadcast %cst_38 : f32 to vector<44x256xf32>
    %94 = arith.subf %93, %70 : vector<44x256xf32>
    %95 = math.sqrt %94 : vector<44x256xf32>
    %96 = arith.mulf %95, %92 : vector<44x256xf32>
    %cst_39 = arith.constant 0.000000e+00 : f32
    %97 = vector.broadcast %cst_39 : f32 to vector<44x256xf32>
    %98 = arith.cmpf olt, %69, %97 : vector<44x256xf32>
    %cst_40 = arith.constant 3.14159274 : f32
    %99 = vector.broadcast %cst_40 : f32 to vector<44x256xf32>
    %100 = arith.subf %99, %96 : vector<44x256xf32>
    %101 = arith.select %98, %100, %96 : vector<44x256xi1>, vector<44x256xf32>
    %cst_41 = arith.constant 0.000000e+00 : f32
    %102 = vector.broadcast %cst_41 : f32 to vector<44x256xf32>
    %103 = arith.subf %102, %101 : vector<44x256xf32>
    %c1_42 = arith.constant 1 : index
    %c0_43 = arith.constant 0 : index
    %c0_44 = arith.constant 0 : index
    %104 = vector.load %arg4[%c1_42, %c0_43, %c0_44] : memref<2x44x256xf32, #tpu.memory_space<vmem>>, vector<1x44x256xf32>
    %105 = vector.shape_cast %104 : vector<1x44x256xf32> to vector<44x256xf32>
    %106 = vector.shape_cast %103 : vector<44x256xf32> to vector<1x44x256xf32>
    tpu.vector_store %arg4[%c1_42, %c0_43, %c0_44], %106 {strides = array<i32>} : memref<2x44x256xf32, #tpu.memory_space<vmem>>, vector<1x44x256xf32>,
    return
  }
  func.func @transform_0(%arg0: i32, %arg1: i32) -> (i32, i32, i32) {
    %c0_i32 = arith.constant 0 : i32
    %c0_i32_0 = arith.constant 0 : i32
    return %arg0, %c0_i32, %arg1 : i32, i32, i32
  }
  func.func @transform_1(%arg0: i32, %arg1: i32) -> (i32, i32) {
    %c0_i32 = arith.constant 0 : i32
    %c0_i32_0 = arith.constant 0 : i32
    %c0_i32_1 = arith.constant 0 : i32
    return %c0_i32, %c0_i32_0 : i32, i32
  }
  func.func @transform_2(%arg0: i32, %arg1: i32) -> (i32, i32, i32) {
    %c0_i32 = arith.constant 0 : i32
    %c0_i32_0 = arith.constant 0 : i32
    return %arg0, %c0_i32, %arg1 : i32, i32, i32
  }
}

</mosaic_0001>

<bundles_post_ra>
// kernel: tpu_custom_call.1
= control target key start
LH: loop header
LB: loop body
LE: loop exit
PB: predicated region body
PF: predicated region fallthrough
CT: control target
= control target key end

     0   :  { %vm35_vm0 = vcmask 1046528   ;;  %v1279_v3 = vmov 0.0   ;;  %vm1280_vm1 = vmmov 1   ;;  %vm72_vm3 = vcmask 252928   ;;  %s2274_s0 = inlined_call_operand.vmem [shape: f32[2,31,256], index: 0, kind: input, shape index: {}]   ;;  %s2275_s1 = inlined_call_operand.vmem [shape: f32[44,31], index: 1, kind: input, shape index: {}]   ;;  %s2276_s2 = inlined_call_operand.vmem [shape: f32[2,44,256], index: 2, kind: output, shape index: {}]  }
   0x1   :  { %v18_v0 = vld [vmem:[%s2274_s0 + $0x8] sm:$0xff]  ;;  %v20_v1 = vld [vmem:[%s2274_s0 + $0x18] sm:$0xff]  ;;  %161 = vmatprep.mubr.f32.mxu0 %v1279_v3  ;;  %707 = vmatprep.mubr.f32.mxu1 %v1279_v3  ;;  %v17_v17 = vld [vmem:[%s2274_s0] sm:$0xff] }
   0x2   :  { %v22_v2 = vld [vmem:[%s2274_s0 + $0x28] sm:$0xff]  ;;  %v24_v4 = vld [vmem:[%s2274_s0 + $0x38] sm:$0x7f]  ;;  %v26_v5 = vmul.f32 %v18_v0, %v18_v0  ;;  %v28_v6 = vmul.f32 %v20_v1, %v20_v1  ;;  %v1193_v8 = vpack.c.bf16 %v20_v1, %v18_v0  ;;  %v19_v21 = vld [vmem:[%s2274_s0 + $0x10] sm:$0xff]  ;;  %v25_v23 = vmul.f32 %v17_v17, %v17_v17 }
   0x3   :  { %v30_v7 = vmul.f32 %v22_v2, %v22_v2  ;;  %v1154_v9 = vld [vmem:[%s2274_s0 + $0x48] sm:$0xff]  ;;  %v1156_v10 = vld [vmem:[%s2274_s0 + $0x58] sm:$0xff]  ;;  %v32_v11 = vmul.f32 %v24_v4, %v24_v4  ;;  %v21_v22 = vld [vmem:[%s2274_s0 + $0x20] sm:$0xff]  ;;  %v27_v26 = vmul.f32 %v19_v21, %v19_v21  ;;  %v1195_v32 = vpack.c.bf16 %v19_v21, %v17_v17 }
   0x4   :  { %v1158_v12 = vld [vmem:[%s2274_s0 + $0x68] sm:$0xff]  ;;  %v1160_v13 = vld [vmem:[%s2274_s0 + $0x78] sm:$0x7f]  ;;  %v592_v14 = vmul.f32 %v1154_v9, %v1154_v9  ;;  %v594_v15 = vmul.f32 %v1156_v10, %v1156_v10  ;;  %v1203_v16 = vpack.c.bf16 %v1156_v10, %v1154_v9  ;;  %v44_v18 = vadd.f32 %v28_v6, %v26_v5  ;;  %1194 = vmatprep.subr.bf16.mxu0 %v1193_v8  ;;  %v1153_v28 = vld [vmem:[%s2274_s0 + $0x40] sm:$0xff] }
   0x5   :  { %v596_v19 = vmul.f32 %v1158_v12, %v1158_v12  ;;  %v598_v20 = vmul.f32 %v1160_v13, %v1160_v13  ;;  %v46_v24 = vsel %vm35_vm0, %v32_v11, 0.0  ;;  %v29_v27 = vmul.f32 %v21_v22, %v21_v22  ;;  %v1155_v29 = vld [vmem:[%s2274_s0 + $0x50] sm:$0xff]  ;;  %v1157_v33 = vld [vmem:[%s2274_s0 + $0x60] sm:$0xff]  ;;  %vm1343_vm2 = vmpackc.low %vm35_vm0, %vm1280_vm1  ;;  %1196 = vmatpush1.bf16.msra.mxu0 %v1195_v32 }
   0x6   :  { %v609_v25 = vadd.f32 %v594_v15, %v592_v14  ;;  %1204 = vmatprep.subr.bf16.mxu1 %v1203_v16  ;;  %v45_v30 = vadd.f32 %v44_v18, %v30_v7  ;;  %v591_v34 = vmul.f32 %v1153_v28, %v1153_v28  ;;  %v33_v36 = vadd.f32 %v27_v26, %v25_v23  ;;  %v23_v40 = vld [vmem:[%s2274_s0 + $0x30] sm:$0x7f]  ;;  %v11_v57 = vld [vmem:[%s2275_s1] sm:$0xff]  ;;  %v12_v59 = vld [vmem:[%s2275_s1 + $0x8] sm:$0xff] }
   0x7   :  { %v611_v31 = vsel %vm35_vm0, %v598_v20, 0.0  ;;  %v593_v37 = vmul.f32 %v1155_v29, %v1155_v29  ;;  %v595_v38 = vmul.f32 %v1157_v33, %v1157_v33  ;;  %v1159_v41 = vld [vmem:[%s2274_s0 + $0x70] sm:$0x7f]  ;;  %v1205_v43 = vpack.c.bf16 %v1155_v29, %v1153_v28  ;;  %v14_v61 = vld [vmem:[%s2275_s1 + $0x18] sm:$0xff]  ;;  %v15_v62 = vld [vmem:[%s2275_s1 + $0x20] sm:$0xff] }
   0x8   :  { %v610_v35 = vadd.f32 %v609_v25, %v596_v19  ;;  %v47_v42 = vadd.f32 %v46_v24, %v45_v30  ;;  %v1197_v44 = vpack.c.bf16 %v24_v4, %v22_v2  ;;  %v1207_v45 = vpack.c.bf16 %v1160_v13, %v1158_v12  ;;  %v13_v60 = vld [vmem:[%s2275_s1 + $0x10] sm:$0xff]  ;;  %v16_v63 = vld [vmem:[%s2275_s1 + $0x28] sm:$0xf] }
   0x9   :  { %v34_v47 = vadd.f32 %v33_v36, %v29_v27  ;;  %v599_v48 = vadd.f32 %v593_v37, %v591_v34  ;;  %v31_v49 = vmul.f32 %v23_v40, %v23_v40  ;;  %1206 = vmatpush1.bf16.msra.mxu1 %v1205_v43  ;;  %v1200_v50 = vpack.c.bf16 %v23_v40, %v21_v22 }
   0xa   :  { %v612_v46 = vadd.f32 %v611_v31, %v610_v35  ;;  %1199 = vmatprep.subr.msk.bf16.mxu0 %vm1343_vm2, %v1197_v44  ;;  %v597_v51 = vmul.f32 %v1159_v41, %v1159_v41  ;;  %v1210_v52 = vpack.c.bf16 %v1159_v41, %v1157_v33  ;;  %1209 = vmatprep.subr.msk.bf16.mxu1 %vm1343_vm2, %v1207_v45  ;;  %v48_v1 = vrot.slane %v47_v42, 4 }
   0xb   :  { %v600_v53 = vadd.f32 %v599_v48, %v595_v38  ;;  %v36_v54 = vsel %vm35_vm0, %v31_v49, 0.0  ;;  %1202 = vmatpush1.bf16.msk.msra.mxu0 %vm1343_vm2, %v1200_v50 }
   0xc   :  { %v37_v55 = vadd.f32 %v36_v54, %v34_v47  ;;  %v601_v56 = vsel %vm35_vm0, %v597_v51, 0.0  ;;  %v613_v4 = vrot.slane %v612_v46, 4  ;;  %v49_v6 = vadd.f32 %v48_v1, %v47_v42 }
   0xd   :  { %v602_v58 = vadd.f32 %v601_v56, %v600_v53  ;;  %1212 = vmatpush1.bf16.msk.msra.mxu1 %vm1343_vm2, %v1210_v52 }
   0xe   :  { %1135 = vmatmul.mubr.msk.f32.vlgmr.msra.gmra.mrb[0].mxu0 %vm72_vm3, %v11_v57  ;;  %v38_v0 = vrot.slane %v37_v55, 4  ;;  %v614_v8 = vadd.f32 %v613_v4, %v612_v46  ;;  %v50_v10 = vrot.slane %v49_v6, 2 }
   0xf   :  { %167 = vmatprep.mubr.f32.mxu0 %v1279_v3  ;;  %v603_v2 = vrot.slane %v602_v58, 4 }
  0x10   :  { %1163 = vmatmul.mubr.msk.f32.vlgmr.msra.gmra.mrb[0].mxu1 %vm72_vm3, %v11_v57  ;;  %v39_v5 = vadd.f32 %v38_v0, %v37_v55  ;;  %v615_v12 = vrot.slane %v614_v8, 2  ;;  %v51_v14 = vadd.f32 %v50_v10, %v49_v6 }
  0x11   :  { %713 = vmatprep.mubr.f32.mxu1 %v1279_v3  ;;  %v604_v7 = vadd.f32 %v603_v2, %v602_v58 }
  0x12   :  { %1136 = vmatmul.mubr.msk.f32.gmra.mrb[2].mxu0 %vm72_vm3, %v12_v59  ;;  %v40_v9 = vrot.slane %v39_v5, 2  ;;  %v52_v17 = vrot.slane %v51_v14, 1 }
  0x13   :  { %173 = vmatprep.mubr.f32.mxu0 %v1279_v3  ;;  %v605_v11 = vrot.slane %v604_v7, 2 }
  0x14   :  { %1164 = vmatmul.mubr.msk.f32.gmra.mrb[2].mxu1 %vm72_vm3, %v12_v59  ;;  %v41_v13 = vadd.f32 %v40_v9, %v39_v5  ;;  %v53_v21 = vadd.f32 %v52_v17, %v51_v14 }
  0x15   :  { %719 = vmatprep.mubr.f32.mxu1 %v1279_v3  ;;  %v606_v15 = vadd.f32 %v605_v11, %v604_v7 }
  0x16   :  { %1137 = vmatmul.mubr.msk.f32.gmra.mrb[4].mxu0 %vm72_vm3, %v13_v60  ;;  %v42_v16 = vrot.slane %v41_v13, 1  ;;  %vm63_vm5 = vcmp.eq.f32.partialorder %v53_v21, inf  ;;  %v66_v34 = vand.u32 2147483648, %v53_v21  ;;  %vm65_vm9 = vcmp.eq.f32.partialorder %v53_v21, 0.0 }
  0x17   :  { %179 = vmatprep.mubr.f32.mxu0 %v1279_v3  ;;  %v607_v18 = vrot.slane %v606_v15, 1 }
  0x18   :  { %1165 = vmatmul.mubr.msk.f32.gmra.mrb[4].mxu1 %vm72_vm3, %v13_v60  ;;  %v43_v20 = vadd.f32 %v42_v16, %v41_v13 }
  0x19   :  { %725 = vmatprep.mubr.f32.mxu1 %v1279_v3  ;;  %v608_v22 = vadd.f32 %v607_v18, %v606_v15 }
  0x1a   :  { %1138 = vmatmul.mubr.msk.f32.gmra.mrb[6].mxu0 %vm72_vm3, %v14_v61  ;;  %1215 = vrsqrt.f32 %v43_v20  ;;  %vm56_vm4 = vcmp.eq.f32.partialorder %v43_v20, inf  ;;  %v59_v31 = vand.u32 2147483648, %v43_v20  ;;  %vm58_vm7 = vcmp.eq.f32.partialorder %v43_v20, 0.0 }
  0x1b   :  { %185 = vmatprep.mubr.f32.mxu0 %v1279_v3  ;;  %1217 = vrsqrt.f32 %v53_v21  ;;  %vm621_vm6 = vcmp.eq.f32.partialorder %v608_v22, inf  ;;  %v624_v35 = vand.u32 2147483648, %v608_v22  ;;  %vm623_vm10 = vcmp.eq.f32.partialorder %v608_v22, 0.0 }
  0x1c   :  { %1166 = vmatmul.mubr.msk.f32.gmra.mrb[6].mxu1 %vm72_vm3, %v14_v61  ;;  %1219 = vrsqrt.f32 %v608_v22 }
  0x1d   :  { %731 = vmatprep.mubr.f32.mxu1 %v1279_v3 }
  0x1e   :  { %1139 = vmatmul.mubr.msk.f32.gmra.mrb[8].mxu0 %vm72_vm3, %v15_v62 }
  0x1f   :  { %191 = vmatprep.mubr.f32.mxu0 %v1279_v3 }
  0x20   :  { %1167 = vmatmul.mubr.msk.f32.gmra.mrb[8].mxu1 %vm72_vm3, %v15_v62 }
  0x21   :  { %737 = vmatprep.mubr.f32.mxu1 %v1279_v3  ;;  %v616_v3 = vadd.f32 %v615_v12, %v614_v8 }
  0x22   :  { %1140 = vmatmul.mubr.msk.f32.gmra.mrb[10].mxu0 %vm72_vm3, %v16_v63 }
  0x23   :  { %v617_v19 = vrot.slane %v616_v3, 1 }
  0x24   :  { %1168 = vmatmul.mubr.msk.f32.gmra.mrb[10].mxu1 %vm72_vm3, %v16_v63  ;;  %v1216_v24 = vpop.eup %1215 }
  0x25   :  { %v618_v23 = vadd.f32 %v617_v19, %v616_v3  ;;  %v1218_v25 = vpop.eup %1217  ;;  %v55_v28 = vmul.f32 %v1216_v24, %v43_v20 }
  0x26   :  { %v1220_v26 = vpop.eup %1219  ;;  %v62_v29 = vmul.f32 %v1218_v25, %v53_v21 }
  0x27   :  { %1221 = vrsqrt.f32 %v618_v23  ;;  %v620_v30 = vmul.f32 %v1220_v26, %v608_v22  ;;  %v57_v33 = vsel %vm56_vm4, %v43_v20, %v55_v28  ;;  %vm628_vm8 = vcmp.eq.f32.partialorder %v618_v23, inf }
  0x28   :  { %v64_v36 = vsel %vm63_vm5, %v53_v21, %v62_v29  ;;  %v631_v38 = vand.u32 2147483648, %v618_v23  ;;  %v60_v39 = vsel %vm58_vm7, %v59_v31, %v57_v33  ;;  %vm630_vm11 = vcmp.eq.f32.partialorder %v618_v23, 0.0 }
  0x29   :  { %v622_v37 = vsel %vm621_vm6, %v608_v22, %v620_v30  ;;  %v67_v41 = vsel %vm65_vm9, %v66_v34, %v64_v36  ;;  %v68_v43 = vadd.f32 1e-05, %v60_v39 }
  0x2a   :  { %v625_v42 = vsel %vm623_vm10, %v624_v35, %v622_v37  ;;  %v69_v45 = vadd.f32 1e-05, %v67_v41 }
  0x2b   :  { %v633_v46 = vadd.f32 1e-05, %v625_v42  ;;  %1223 = vrcp.f32 %v68_v43 }
  0x2c   :  { %1225 = vrcp.f32 %v69_v45 }
  0x2d   :  { %1227 = vrcp.f32 %v633_v46 }
  0x31   :  { %v1222_v27 = vpop.eup %1221 }
  0x32   :  { %v627_v32 = vmul.f32 %v1222_v27, %v618_v23 }
  0x34   :  { %v629_v40 = vsel %vm628_vm8, %v618_v23, %v627_v32 }
  0x35   :  { %v632_v44 = vsel %vm630_vm11, %v631_v38, %v629_v40  ;;  %v1403_v48 = vpop.eup %1223 }
  0x36   :  { %v634_v47 = vadd.f32 1e-05, %v632_v44  ;;  %v1405_v49 = vpop.eup %1225 }
  0x37   :  { %v1407_v50 = vpop.eup %1227 }
  0x38   :  { %1229 = vrcp.f32 %v634_v47 }
  0x42   :  { %v1409_v52 = vpop.eup %1229 }
  0xe1   :  { %v163_v51 = vpop.f32.mrb[0].mxu0 }
  0xe2   :  { %v1412_v53 = vmul.f32 %v1403_v48, %v163_v51  ;;  %v165_v54 = vpop.f32.mrb[1].mxu0 }
  0xe3   :  { %v709_v55 = vpop.f32.mrb[0].mxu1  ;;  %v1415_v56 = vmul.f32 %v1405_v49, %v165_v54 }
  0xe4   :  { %v1141_v57 = vclamps-f32 %v1412_v53, 0.99999  ;;  %v1419_v58 = vmul.f32 %v1407_v50, %v709_v55  ;;  %v711_v59 = vpop.f32.mrb[1].mxu1 }
  0xe5   :  { %v1142_v60 = vclamps-f32 %v1415_v56, 0.99999  ;;  %v1423_v61 = vmul.f32 %v1409_v52, %v711_v59  ;;  %v169_v62 = vpop.f32.mrb[2].mxu0 }
  0xe6   :  { %v1427_v63 = vand.u32 2147483647, %v1141_v57  ;;  %v1169_v0 = vclamps-f32 %v1419_v58, 0.99999  ;;  %v171_v1 = vpop.f32.mrb[3].mxu0  ;;  %v1457_v16 = vmul.f32 %v1403_v48, %v169_v62  ;;  %vm1559_vm3 = vcmp.lt.f32.partialorder %v1141_v57, 0.0 }
  0xe7   :  { %v1432_v2 = vand.u32 2147483647, %v1142_v60  ;;  %v2278_v4 = vclamps-f32 %v1423_v61, 0.99999  ;;  %v715_v5 = vpop.f32.mrb[2].mxu1  ;;  %v1508_v59 = vmul.f32 %v1405_v49, %v171_v1  ;;  %vm1579_vm5 = vcmp.lt.f32.partialorder %v1142_v60, 0.0 }
  0xe8   :  { %v246_v6 = vmul.f32 -0.0012624911, %v1427_v63  ;;  %v1437_v7 = vsub.f32 1.0, %v1427_v63  ;;  %v1441_v8 = vand.u32 2147483647, %v1169_v0  ;;  %v1447_v12 = vpop.f32.mrb[3].mxu1  ;;  %v1504_v47 = vmul.f32 %v1407_v50, %v715_v5 }
  0xe9   :  { %v247_v9 = vmul.f32 -0.0012624911, %v1432_v2  ;;  %v1445_v11 = vsub.f32 1.0, %v1432_v2  ;;  %v1449_v13 = vpop.f32.mrb[4].mxu0  ;;  %v1454_v3 = vand.u32 2147483647, %v2278_v4 }
  0xea   :  { %v258_v10 = vadd.f32 0.00667009, %v246_v6  ;;  %v792_v14 = vmul.f32 -0.0012624911, %v1441_v8  ;;  %1231 = vrsqrt.f32 %v1437_v7  ;;  %v1463_v19 = vpop.f32.mrb[5].mxu0  ;;  %v1466_v21 = vsub.f32 1.0, %v1441_v8 }
  0xeb   :  { %v259_v15 = vadd.f32 0.00667009, %v247_v9  ;;  %v1461_v18 = vpop.f32.mrb[4].mxu1  ;;  %1233 = vrsqrt.f32 %v1445_v11  ;;  %v793_v28 = vmul.f32 -0.0012624911, %v1454_v3  ;;  %v1483_v33 = vsub.f32 1.0, %v1454_v3 }
  0xec   :  { %v270_v17 = vmul.f32 %v258_v10, %v1427_v63  ;;  %v804_v20 = vadd.f32 0.00667009, %v792_v14  ;;  %v1468_v22 = vpop.f32.mrb[5].mxu1  ;;  %v2277_v29 = vclamps-f32 %v1457_v16, 0.99999  ;;  %1235 = vrsqrt.f32 %v1466_v21 }
  0xed   :  { %v1470_v23 = vpop.f32.mrb[6].mxu0  ;;  %v271_v25 = vmul.f32 %v259_v15, %v1432_v2  ;;  %v805_v36 = vadd.f32 0.00667009, %v793_v28  ;;  %1237 = vrsqrt.f32 %v1483_v33  ;;  %vm428_vm12 = vcmp.eq.f32.partialorder %v1437_v7, inf }
  0xee   :  { %v282_v24 = vadd.f32 -0.017088126, %v270_v17  ;;  %v1473_v26 = vpop.f32.mrb[7].mxu0  ;;  %v816_v27 = vmul.f32 %v804_v20, %v1441_v8  ;;  %v1497_v43 = vand.u32 2147483647, %v2277_v29  ;;  %v431_v9 = vand.u32 2147483648, %v1437_v7 }
  0xef   :  { %v1479_v30 = vpop.f32.mrb[6].mxu1  ;;  %v283_v32 = vadd.f32 -0.017088126, %v271_v25  ;;  %v817_v42 = vmul.f32 %v805_v36, %v1454_v3  ;;  %vm430_vm13 = vcmp.eq.f32.partialorder %v1437_v7, 0.0  ;;  %v977_v15 = vand.u32 2147483648, %v1466_v21 }
  0xf0   :  { %v294_v31 = vmul.f32 %v282_v24, %v1427_v63  ;;  %v1485_v34 = vpop.f32.mrb[7].mxu1  ;;  %v828_v35 = vadd.f32 -0.017088126, %v816_v27  ;;  %v248_v55 = vmul.f32 -0.0012624911, %v1497_v43  ;;  %vm435_vm14 = vcmp.eq.f32.partialorder %v1445_v11, inf }
  0xf1   :  { %v1488_v37 = vpop.f32.mrb[8].mxu0  ;;  %v295_v39 = vmul.f32 %v283_v32, %v1432_v2  ;;  %v829_v54 = vadd.f32 -0.017088126, %v817_v42  ;;  %v438_v27 = vand.u32 2147483648, %v1445_v11  ;;  %v2279_v28 = vclamps-f32 %v1504_v47, 0.99999 }
  0xf2   :  { %v306_v38 = vadd.f32 0.03089188, %v294_v31  ;;  %v1491_v40 = vpop.f32.mrb[9].mxu0  ;;  %v840_v41 = vmul.f32 %v828_v35, %v1441_v8  ;;  %vm974_vm15 = vcmp.eq.f32.partialorder %v1466_v21, inf  ;;  %vm437_vm0 = vcmp.eq.f32.partialorder %v1445_v11, 0.0 }
  0xf3   :  { %v1499_v44 = vpop.f32.mrb[8].mxu1  ;;  %v307_v46 = vadd.f32 0.03089188, %v295_v39  ;;  %v841_v1 = vmul.f32 %v829_v54, %v1454_v3  ;;  %v260_v39 = vadd.f32 0.00667009, %v248_v55  ;;  %vm981_vm1 = vcmp.eq.f32.partialorder %v1483_v33, inf }
  0xf4   :  { %v318_v45 = vmul.f32 %v306_v38, %v1427_v63  ;;  %v852_v51 = vadd.f32 0.03089188, %v840_v41  ;;  %v1232_v62 = vpop.eup %1231  ;;  %v1513_v14 = vpop.f32.mrb[9].mxu1  ;;  %vm976_vm2 = vcmp.eq.f32.partialorder %v1466_v21, 0.0  ;;  %vm983_vm4 = vcmp.eq.f32.partialorder %v1483_v33, 0.0 }
  0xf5   :  { %v319_v10 = vmul.f32 %v307_v46, %v1432_v2  ;;  %v1520_v17 = vpop.f32.mrb[10].mxu0  ;;  %v1234_v32 = vpop.eup %1233  ;;  %v427_v35 = vmul.f32 %v1232_v62, %v1437_v7  ;;  %v853_v38 = vadd.f32 0.03089188, %v841_v1  ;;  %v2280_v46 = vclamps-f32 %v1508_v59, 0.99999 }
  0xf6   :  { %v330_v6 = vadd.f32 -0.050174303, %v318_v45  ;;  %v864_v5 = vmul.f32 %v852_v51, %v1441_v8  ;;  %v1527_v31 = vpop.f32.mrb[11].mxu0  ;;  %v1534_v45 = vsub.f32 1.0, %v1497_v43  ;;  %v1236_v51 = vpop.eup %1235  ;;  %v434_v1 = vmul.f32 %v1234_v32, %v1445_v11 }
  0xf7   :  { %v1522_v20 = vpop.f32.mrb[10].mxu1  ;;  %v331_v25 = vadd.f32 -0.050174303, %v319_v10  ;;  %v865_v62 = vmul.f32 %v853_v38, %v1454_v3  ;;  %v272_v10 = vmul.f32 %v260_v39, %v1497_v43  ;;  %v1238_v29 = vpop.eup %1237  ;;  %vm1589_vm6 = vcmp.lt.f32.partialorder %v1169_v0, 0.0 }
  0xf8   :  { %v342_v24 = vmul.f32 %v330_v6, %v1427_v63  ;;  %v876_v36 = vadd.f32 -0.050174303, %v864_v5  ;;  %v984_v6 = vand.u32 2147483648, %v1483_v33  ;;  %1239 = vrsqrt.f32 %v1534_v45  ;;  %v1555_v4 = vpop.f32.mrb[11].mxu1 }
  0xf9   :  { %v343_v42 = vmul.f32 %v331_v25, %v1432_v2  ;;  %v429_v25 = vsel %vm428_vm12, %v1437_v7, %v427_v35  ;;  %v877_v38 = vadd.f32 -0.050174303, %v865_v62  ;;  %v284_v39 = vadd.f32 -0.017088126, %v272_v10 }
  0xfa   :  { %v354_v41 = vadd.f32 0.08897899, %v342_v24  ;;  %v888_v54 = vmul.f32 %v876_v36, %v1441_v8  ;;  %v1546_v24 = vand.u32 2147483647, %v2279_v28  ;;  %v1569_v62 = vand.u32 2147483647, %v2280_v46 }
  0xfb   :  { %v355_v5 = vadd.f32 0.08897899, %v343_v42  ;;  %v973_v42 = vmul.f32 %v1236_v51, %v1466_v21  ;;  %v296_v51 = vmul.f32 %v284_v39, %v1497_v43  ;;  %v432_v53 = vsel %vm430_vm13, %v431_v9, %v429_v25 }
  0xfc   :  { %v366_v55 = vmul.f32 %v354_v41, %v1427_v63  ;;  %v900_v36 = vadd.f32 0.08897899, %v888_v54  ;;  %v889_v54 = vmul.f32 %v877_v38, %v1454_v3  ;;  %v980_v39 = vmul.f32 %v1238_v29, %v1483_v33 }
  0xfd   :  { %v367_v32 = vmul.f32 %v355_v5, %v1432_v2  ;;  %v308_v46 = vadd.f32 0.03089188, %v296_v51  ;;  %v975_v7 = vsel %vm974_vm15, %v1466_v21, %v973_v42  ;;  %v794_v60 = vmul.f32 -0.0012624911, %v1546_v24 }
  0xfe   :  { %v378_v41 = vadd.f32 -0.2145988, %v366_v55  ;;  %v912_v35 = vmul.f32 %v900_v36, %v1441_v8  ;;  %v436_v55 = vsel %vm435_vm14, %v1445_v11, %v434_v1  ;;  %v901_v38 = vadd.f32 0.08897899, %v889_v54 }
  0xff   :  { %v379_v57 = vadd.f32 -0.2145988, %v367_v32  ;;  %v439_v29 = vsel %vm437_vm0, %v438_v27, %v436_v55  ;;  %v806_v58 = vadd.f32 0.00667009, %v794_v60  ;;  %v1601_v0 = vsub.f32 1.0, %v1546_v24 }
 0x100   :  { %v390_v10 = vmul.f32 %v378_v41, %v1427_v63  ;;  %v924_v5 = vadd.f32 -0.2145988, %v912_v35  ;;  %v913_v25 = vmul.f32 %v901_v38, %v1454_v3  ;;  %v320_v41 = vmul.f32 %v308_v46, %v1497_v43 }
 0x101   :  { %v391_v56 = vmul.f32 %v379_v57, %v1432_v2  ;;  %v982_v2 = vsel %vm981_vm1, %v1483_v33, %v980_v39  ;;  %v978_v11 = vsel %vm976_vm2, %v977_v15, %v975_v7  ;;  %v818_v46 = vmul.f32 %v806_v58, %v1546_v24 }
 0x102   :  { %v402_v63 = vadd.f32 1.5707963, %v390_v10  ;;  %v936_v1 = vmul.f32 %v924_v5, %v1441_v8  ;;  %v925_v54 = vadd.f32 -0.2145988, %v913_v25  ;;  %v332_v8 = vadd.f32 -0.050174303, %v320_v41  ;;  %v1240_v5 = vpop.eup %1239 }
 0x103   :  { %v403_v32 = vadd.f32 1.5707963, %v391_v56  ;;  %v1615_v55 = vmul.f32 %v1409_v52, %v1447_v12  ;;  %v985_v21 = vsel %vm983_vm4, %v984_v6, %v982_v2  ;;  %v830_v15 = vadd.f32 -0.017088126, %v818_v46 }
 0x104   :  { %v510_v42 = vmul.f32 %v432_v53, %v402_v63  ;;  %v948_v35 = vadd.f32 1.5707963, %v936_v1  ;;  %v937_v53 = vmul.f32 %v925_v54, %v1454_v3  ;;  %v344_v57 = vmul.f32 %v332_v8, %v1497_v43 }
 0x105   :  { %v511_v27 = vmul.f32 %v439_v29, %v403_v32  ;;  %1241 = vrsqrt.f32 %v1601_v0  ;;  %v842_v60 = vmul.f32 %v830_v15, %v1546_v24  ;;  %v1629_v28 = vmul.f32 %v1403_v48, %v1449_v13 }
 0x106   :  { %v534_v51 = vsub.f32 3.1415927, %v510_v42  ;;  %v1056_v10 = vmul.f32 %v978_v11, %v948_v35  ;;  %v949_v3 = vadd.f32 1.5707963, %v937_v53  ;;  %v356_v56 = vadd.f32 0.08897899, %v344_v57 }
 0x107   :  { %v535_v39 = vsub.f32 3.1415927, %v511_v27  ;;  %v441_v29 = vmul.f32 %v1240_v5, %v1534_v45  ;;  %v854_v41 = vadd.f32 0.03089188, %v842_v60  ;;  %v2289_v13 = vclamps-f32 %v1423_v61, 0.99999 }
 0x108   :  { %v546_v38 = vsel %vm1559_vm3, %v534_v51, %v510_v42  ;;  %v1080_v7 = vsub.f32 3.1415927, %v1056_v10  ;;  %v1057_v1 = vmul.f32 %v985_v21, %v949_v3  ;;  %v368_v25 = vmul.f32 %v356_v56, %v1497_v43 }
 0x109   :  { %v558_v63 = vsub.f32 0.0, %v546_v38  ;;  %v547_v12 = vsel %vm1579_vm5, %v535_v39, %v511_v27  ;;  %v249_v42 = vmul.f32 -0.0012624911, %v1569_v62  ;;  %vm1069_vm7 = vcmp.lt.f32.partialorder %v2289_v13, 0.0 }
 0x10a   :  { %v1092_v33 = vsel %vm1589_vm6, %v1080_v7, %v1056_v10  ;;  %v559_v6 = vsub.f32 0.0, %v547_v12  ;;  %v1081_v32 = vsub.f32 3.1415927, %v1057_v1  ;;  %v1645_v9 = vsub.f32 1.0, %v1569_v62 }
 0x10b   :  { %570 = vst [vmem:[%s2276_s2] sm:$0xff] %v558_v63  ;;  %v1104_v36 = vsub.f32 0.0, %v1092_v33  ;;  %v1172_v58 = vclamps-f32 %v1615_v55, 0.99999  ;;  %v380_v35 = vadd.f32 -0.2145988, %v368_v25  ;;  %vm442_vm8 = vcmp.eq.f32.partialorder %v1534_v45, inf }
 0x10c   :  { %571 = vst [vmem:[%s2276_s2 + $0x8] sm:$0xff] %v559_v6  ;;  %v866_v54 = vmul.f32 %v854_v41, %v1546_v24  ;;  %v261_v2 = vadd.f32 0.00667009, %v249_v42  ;;  %v1093_v8 = vsel %vm1069_vm7, %v1081_v32, %v1057_v1  ;;  %v443_v61 = vsel %vm442_vm8, %v1534_v45, %v441_v29 }
 0x10d   :  { %1181 = vst [vmem:[%s2276_s2 + $0x60] sm:$0xff] %v1104_v36  ;;  %1243 = vrsqrt.f32 %v1645_v9  ;;  %v1145_v51 = vclamps-f32 %v1629_v28, 0.99999  ;;  %v1105_v11 = vsub.f32 0.0, %v1093_v8  ;;  %v392_v27 = vmul.f32 %v380_v35, %v1497_v43 }
 0x10e   :  { %v878_v46 = vadd.f32 -0.050174303, %v866_v54  ;;  %v273_v10 = vmul.f32 %v261_v2, %v1569_v62  ;;  %v445_v53 = vand.u32 2147483648, %v1534_v45  ;;  %v1661_v57 = vand.u32 2147483647, %v1172_v58 }
 0x10f   :  { %1182 = vst [vmem:[%s2276_s2 + $0x68] sm:$0xff] %v1105_v11  ;;  %v404_v5 = vadd.f32 1.5707963, %v392_v27  ;;  %vm444_vm9 = vcmp.eq.f32.partialorder %v1534_v45, 0.0  ;;  %v1242_v43 = vpop.eup %1241  ;;  %v1674_v7 = vand.u32 2147483647, %v1145_v51  ;;  %v1679_v45 = vmul.f32 %v1407_v50, %v1461_v18 }
 0x110   :  { %v890_v38 = vmul.f32 %v878_v46, %v1546_v24  ;;  %v285_v39 = vadd.f32 -0.017088126, %v273_v10  ;;  %v446_v21 = vsel %vm444_vm9, %v445_v53, %v443_v61  ;;  %v795_v15 = vmul.f32 -0.0012624911, %v1661_v57 }
 0x111   :  { %v1670_v63 = vsub.f32 1.0, %v1661_v57  ;;  %v512_v3 = vmul.f32 %v446_v21, %v404_v5  ;;  %v2290_v60 = vclamps-f32 %v1457_v16, 0.99999  ;;  %v987_v29 = vmul.f32 %v1242_v43, %v1601_v0 }
 0x112   :  { %v902_v12 = vadd.f32 0.08897899, %v890_v38  ;;  %v297_v56 = vmul.f32 %v285_v39, %v1569_v62  ;;  %v807_v33 = vadd.f32 0.00667009, %v795_v15  ;;  %v250_v41 = vmul.f32 -0.0012624911, %v1674_v7 }
 0x113   :  { %vm524_vm10 = vcmp.lt.f32.partialorder %v2290_v60, 0.0  ;;  %v536_v6 = vsub.f32 3.1415927, %v512_v3  ;;  %1245 = vrsqrt.f32 %v1670_v63  ;;  %v1689_v42 = vsub.f32 1.0, %v1674_v7 }
 0x114   :  { %v914_v1 = vmul.f32 %v902_v12, %v1546_v24  ;;  %v309_v36 = vadd.f32 0.03089188, %v297_v56  ;;  %v819_v25 = vmul.f32 %v807_v33, %v1661_v57  ;;  %v1173_v32 = vclamps-f32 %v1679_v45, 0.99999 }
 0x115   :  { %v548_v18 = vsel %vm524_vm10, %v536_v6, %v512_v3  ;;  %vm988_vm11 = vcmp.eq.f32.partialorder %v1601_v0, inf  ;;  %v262_v8 = vadd.f32 0.00667009, %v250_v41  ;;  %vm990_vm12 = vcmp.eq.f32.partialorder %v1601_v0, 0.0 }
 0x116   :  { %v926_v13 = vadd.f32 -0.2145988, %v914_v1  ;;  %v321_v16 = vmul.f32 %v309_v36, %v1569_v62  ;;  %v560_v54 = vsub.f32 0.0, %v548_v18  ;;  %v831_v2 = vadd.f32 -0.017088126, %v819_v25 }
 0x117   :  { %v1244_v35 = vpop.eup %1243  ;;  %v989_v11 = vsel %vm988_vm11, %v1601_v0, %v987_v29  ;;  %v991_v46 = vand.u32 2147483648, %v1601_v0  ;;  %v274_v53 = vmul.f32 %v262_v8, %v1674_v7  ;;  %1247 = vrsqrt.f32 %v1689_v42 }
 0x118   :  { %v938_v61 = vmul.f32 %v926_v13, %v1546_v24  ;;  %v333_v27 = vadd.f32 -0.050174303, %v321_v16  ;;  %572 = vst [vmem:[%s2276_s2 + $0x10] sm:$0xff] %v560_v54  ;;  %v843_v10 = vmul.f32 %v831_v2, %v1661_v57  ;;  %v1707_v24 = vand.u32 2147483647, %v1173_v32 }
 0x119   :  { %v992_v39 = vsel %vm990_vm12, %v991_v46, %v989_v11  ;;  %v448_v43 = vmul.f32 %v1244_v35, %v1645_v9  ;;  %v286_v15 = vadd.f32 -0.017088126, %v274_v53  ;;  %v1713_v56 = vmul.f32 %v1405_v49, %v1463_v19 }
 0x11a   :  { %v950_v5 = vadd.f32 1.5707963, %v938_v61  ;;  %v345_v38 = vmul.f32 %v333_v27, %v1569_v62  ;;  %v855_v21 = vadd.f32 0.03089188, %v843_v10  ;;  %v796_v12 = vmul.f32 -0.0012624911, %v1707_v24 }
 0x11b   :  { %v2291_v60 = vclamps-f32 %v1504_v47, 0.99999  ;;  %vm449_vm14 = vcmp.eq.f32.partialorder %v1645_v9, inf  ;;  %v298_v6 = vmul.f32 %v286_v15, %v1674_v7  ;;  %v1722_v25 = vsub.f32 1.0, %v1707_v24 }
 0x11c   :  { %v1058_v3 = vmul.f32 %v992_v39, %v950_v5  ;;  %v357_v0 = vadd.f32 0.08897899, %v345_v38  ;;  %v867_v33 = vmul.f32 %v855_v21, %v1661_v57  ;;  %v808_v36 = vadd.f32 0.00667009, %v796_v12 }
 0x11d   :  { %vm1070_vm13 = vcmp.lt.f32.partialorder %v2291_v60, 0.0  ;;  %v1246_v41 = vpop.eup %1245  ;;  %v450_v19 = vsel %vm449_vm14, %v1645_v9, %v448_v43  ;;  %vm451_vm15 = vcmp.eq.f32.partialorder %v1645_v9, 0.0  ;;  %v310_v18 = vadd.f32 0.03089188, %v298_v6 }
 0x11e   :  { %v1082_v1 = vsub.f32 3.1415927, %v1058_v3  ;;  %v369_v29 = vmul.f32 %v357_v0, %v1569_v62  ;;  %v879_v47 = vadd.f32 -0.050174303, %v867_v33  ;;  %v820_v35 = vmul.f32 %v808_v36, %v1707_v24 }
 0x11f   :  { %v1146_v54 = vclamps-f32 %v1713_v56, 0.99999  ;;  %v2292_v8 = vclamps-f32 %v1508_v59, 0.99999  ;;  %v322_v27 = vmul.f32 %v310_v18, %v1674_v7  ;;  %v1738_v46 = vmul.f32 %v1409_v52, %v1468_v22 }
 0x120   :  { %v1094_v13 = vsel %vm1070_vm13, %v1082_v1, %v1058_v3  ;;  %v381_v16 = vadd.f32 -0.2145988, %v369_v29  ;;  %v891_v11 = vmul.f32 %v879_v47, %v1661_v57  ;;  %v994_v53 = vmul.f32 %v1246_v41, %v1670_v63 }
 0x121   :  { %v1106_v2 = vsub.f32 0.0, %v1094_v13  ;;  %vm1730_vm0 = vcmp.lt.f32.partialorder %v2292_v8, 0.0  ;;  %v832_v5 = vadd.f32 -0.017088126, %v820_v35  ;;  %1249 = vrsqrt.f32 %v1722_v25  ;;  %v1248_v43 = vpop.eup %1247 }
 0x122   :  { %v393_v10 = vmul.f32 %v381_v16, %v1569_v62  ;;  %v452_v59 = vand.u32 2147483648, %v1645_v9  ;;  %v903_v38 = vadd.f32 0.08897899, %v891_v11  ;;  %vm995_vm1 = vcmp.eq.f32.partialorder %v1670_v63, inf }
 0x123   :  { %1183 = vst [vmem:[%s2276_s2 + $0x70] sm:$0xff] %v1106_v2  ;;  %v334_v39 = vadd.f32 -0.050174303, %v322_v27  ;;  %v998_v21 = vand.u32 2147483648, %v1670_v63  ;;  %v844_v62 = vmul.f32 %v832_v5, %v1707_v24  ;;  %v1752_v15 = vand.u32 2147483647, %v1146_v54 }
 0x124   :  { %v405_v22 = vadd.f32 1.5707963, %v393_v10  ;;  %v453_v3 = vsel %vm451_vm15, %v452_v59, %v450_v19  ;;  %v915_v0 = vmul.f32 %v903_v38, %v1661_v57  ;;  %v1174_v60 = vclamps-f32 %v1738_v46, 0.99999 }
 0x125   :  { %v346_v12 = vmul.f32 %v334_v39, %v1674_v7  ;;  %v996_v6 = vsel %vm995_vm1, %v1670_v63, %v994_v53  ;;  %v856_v1 = vadd.f32 0.03089188, %v844_v62  ;;  %v251_v29 = vmul.f32 -0.0012624911, %v1752_v15 }
 0x126   :  { %v513_v33 = vmul.f32 %v453_v3, %v405_v22  ;;  %v927_v36 = vadd.f32 -0.2145988, %v915_v0  ;;  %v455_v47 = vmul.f32 %v1248_v43, %v1689_v42  ;;  %v1763_v18 = vsub.f32 1.0, %v1752_v15 }
 0x127   :  { %v358_v41 = vadd.f32 0.08897899, %v346_v12  ;;  %vm1767_vm2 = vcmp.lt.f32.partialorder %v1172_v58, 0.0  ;;  %v868_v13 = vmul.f32 %v856_v1, %v1707_v24  ;;  %v263_v16 = vadd.f32 0.00667009, %v251_v29 }
 0x128   :  { %v537_v9 = vsub.f32 3.1415927, %v513_v33  ;;  %v1774_v35 = vand.u32 2147483647, %v1174_v60  ;;  %v939_v2 = vmul.f32 %v927_v36, %v1661_v57  ;;  %vm997_vm3 = vcmp.eq.f32.partialorder %v1670_v63, 0.0 }
 0x129   :  { %v370_v8 = vmul.f32 %v358_v41, %v1674_v7  ;;  %vm456_vm4 = vcmp.eq.f32.partialorder %v1689_v42, inf  ;;  %v999_v58 = vsel %vm997_vm3, %v998_v21, %v996_v6  ;;  %v880_v11 = vadd.f32 -0.050174303, %v868_v13 }
 0x12a   :  { %v549_v55 = vsel %vm1730_vm0, %v537_v9, %v513_v33  ;;  %v275_v27 = vmul.f32 %v263_v16, %v1752_v15  ;;  %v951_v53 = vadd.f32 1.5707963, %v939_v2  ;;  %1251 = vrsqrt.f32 %v1763_v18 }
 0x12b   :  { %v561_v10 = vsub.f32 0.0, %v549_v55  ;;  %v382_v5 = vadd.f32 -0.2145988, %v370_v8  ;;  %v1250_v59 = vpop.eup %1249  ;;  %v457_v57 = vsel %vm456_vm4, %v1689_v42, %v455_v47  ;;  %vm1787_vm5 = vcmp.lt.f32.partialorder %v1145_v51, 0.0 }
 0x12c   :  { %v892_v61 = vmul.f32 %v880_v11, %v1707_v24  ;;  %v287_v38 = vadd.f32 -0.017088126, %v275_v27  ;;  %v797_v39 = vmul.f32 -0.0012624911, %v1774_v35  ;;  %v1059_v43 = vmul.f32 %v999_v58, %v951_v53 }
 0x12d   :  { %573 = vst [vmem:[%s2276_s2 + $0x18] sm:$0xff] %v561_v10  ;;  %v394_v22 = vmul.f32 %v382_v5, %v1674_v7  ;;  %v459_v21 = vand.u32 2147483648, %v1689_v42  ;;  %v1800_v28 = vmul.f32 %v1403_v48, %v1470_v23  ;;  %vm458_vm6 = vcmp.eq.f32.partialorder %v1689_v42, 0.0 }
 0x12e   :  { %v904_v51 = vadd.f32 0.08897899, %v892_v61  ;;  %v299_v62 = vmul.f32 %v287_v38, %v1752_v15  ;;  %v809_v3 = vadd.f32 0.00667009, %v797_v39  ;;  %v1083_v0 = vsub.f32 3.1415927, %v1059_v43 }
 0x12f   :  { %v406_v12 = vadd.f32 1.5707963, %v394_v22  ;;  %v460_v33 = vsel %vm458_vm6, %v459_v21, %v457_v57  ;;  %v1001_v6 = vmul.f32 %v1250_v59, %v1722_v25  ;;  %v1808_v36 = vsub.f32 1.0, %v1774_v35 }
 0x130   :  { %v916_v1 = vmul.f32 %v904_v51, %v1707_v24  ;;  %v311_v7 = vadd.f32 0.03089188, %v299_v62  ;;  %v821_v29 = vmul.f32 %v809_v3, %v1774_v35  ;;  %v1095_v23 = vsel %vm1767_vm2, %v1083_v0, %v1059_v43 }
 0x131   :  { %v514_v42 = vmul.f32 %v460_v33, %v406_v12  ;;  %vm1002_vm7 = vcmp.eq.f32.partialorder %v1722_v25, inf  ;;  %v1147_v41 = vclamps-f32 %v1800_v28, 0.99999  ;;  %v1107_v47 = vsub.f32 0.0, %v1095_v23 }
 0x132   :  { %v928_v9 = vadd.f32 -0.2145988, %v916_v1  ;;  %v323_v13 = vmul.f32 %v311_v7, %v1752_v15  ;;  %v833_v16 = vadd.f32 -0.017088126, %v821_v29  ;;  %v1003_v8 = vsel %vm1002_vm7, %v1722_v25, %v1001_v6 }
 0x133   :  { %v538_v2 = vsub.f32 3.1415927, %v514_v42  ;;  %vm1004_vm8 = vcmp.eq.f32.partialorder %v1722_v25, 0.0  ;;  %v1819_v55 = vand.u32 2147483647, %v1147_v41  ;;  %1184 = vst [vmem:[%s2276_s2 + $0x78] sm:$0xff] %v1107_v47  ;;  %1253 = vrsqrt.f32 %v1808_v36 }
 0x134   :  { %v940_v19 = vmul.f32 %v928_v9, %v1707_v24  ;;  %v335_v58 = vadd.f32 -0.050174303, %v323_v13  ;;  %v845_v11 = vmul.f32 %v833_v16, %v1774_v35  ;;  %v1252_v27 = vpop.eup %1251  ;;  %v1005_v53 = vand.u32 2147483648, %v1722_v25 }
 0x135   :  { %v550_v10 = vsel %vm1787_vm5, %v538_v2, %v514_v42  ;;  %v252_v5 = vmul.f32 -0.0012624911, %v1819_v55  ;;  %v1833_v59 = vmul.f32 %v1407_v50, %v1479_v30  ;;  %v1837_v38 = vsub.f32 1.0, %v1819_v55 }
 0x136   :  { %v562_v57 = vsub.f32 0.0, %v550_v10  ;;  %v952_v61 = vadd.f32 1.5707963, %v940_v19  ;;  %v347_v24 = vmul.f32 %v335_v58, %v1752_v15  ;;  %v1006_v39 = vsel %vm1004_vm8, %v1005_v53, %v1003_v8 }
 0x137   :  { %v857_v63 = vadd.f32 0.03089188, %v845_v11  ;;  %v264_v43 = vadd.f32 0.00667009, %v252_v5  ;;  %vm1072_vm9 = vcmp.lt.f32.partialorder %v1173_v32, 0.0  ;;  %v462_v21 = vmul.f32 %v1252_v27, %v1763_v18 }
 0x138   :  { %574 = vst [vmem:[%s2276_s2 + $0x20] sm:$0xff] %v562_v57  ;;  %v1060_v22 = vmul.f32 %v1006_v39, %v952_v61  ;;  %v359_v30 = vadd.f32 0.08897899, %v347_v24  ;;  %vm463_vm10 = vcmp.eq.f32.partialorder %v1763_v18, inf  ;;  %v1175_v62 = vclamps-f32 %v1833_v59, 0.99999 }
 0x139   :  { %v869_v51 = vmul.f32 %v857_v63, %v1774_v35  ;;  %v276_v25 = vmul.f32 %v264_v43, %v1819_v55  ;;  %1255 = vrsqrt.f32 %v1837_v38  ;;  %v1855_v45 = vmul.f32 %v1405_v49, %v1473_v26 }
 0x13a   :  { %v1084_v3 = vsub.f32 3.1415927, %v1060_v22  ;;  %v371_v0 = vmul.f32 %v359_v30, %v1752_v15  ;;  %v1859_v33 = vand.u32 2147483647, %v1175_v62  ;;  %v464_v7 = vsel %vm463_vm10, %v1763_v18, %v462_v21 }
 0x13b   :  { %v881_v32 = vadd.f32 -0.050174303, %v869_v51  ;;  %v288_v12 = vadd.f32 -0.017088126, %v276_v25  ;;  %v466_v29 = vand.u32 2147483648, %v1763_v18  ;;  %v1867_v26 = vmul.f32 %v1409_v52, %v1485_v34 }
 0x13c   :  { %v1096_v6 = vsel %vm1072_vm9, %v1084_v3, %v1060_v22  ;;  %v383_v1 = vadd.f32 -0.2145988, %v371_v0  ;;  %v798_v16 = vmul.f32 -0.0012624911, %v1859_v33  ;;  %v1872_v2 = vsub.f32 1.0, %v1859_v33 }
 0x13d   :  { %v1108_v23 = vsub.f32 0.0, %v1096_v6  ;;  %v893_v42 = vmul.f32 %v881_v32, %v1774_v35  ;;  %v300_v47 = vmul.f32 %v288_v12, %v1819_v55  ;;  %v1254_v9 = vpop.eup %1253  ;;  %v1148_v8 = vclamps-f32 %v1855_v45, 0.99999 }
 0x13e   :  { %v395_v13 = vmul.f32 %v383_v1, %v1752_v15  ;;  %vm465_vm11 = vcmp.eq.f32.partialorder %v1763_v18, 0.0  ;;  %vm1881_vm12 = vcmp.lt.f32.partialorder %v1146_v54, 0.0  ;;  %vm1009_vm13 = vcmp.eq.f32.partialorder %v1808_v36, inf }
 0x13f   :  { %1185 = vst [vmem:[%s2276_s2 + $0x80] sm:$0xff] %v1108_v23  ;;  %v905_v15 = vadd.f32 0.08897899, %v893_v42  ;;  %v312_v19 = vadd.f32 0.03089188, %v300_v47  ;;  %v467_v11 = vsel %vm465_vm11, %v466_v29, %v464_v7  ;;  %v1008_v53 = vmul.f32 %v1254_v9, %v1808_v36 }
 0x140   :  { %v407_v58 = vadd.f32 1.5707963, %v395_v13  ;;  %v810_v27 = vadd.f32 0.00667009, %v798_v16  ;;  %v1176_v18 = vclamps-f32 %v1867_v26, 0.99999  ;;  %1257 = vrsqrt.f32 %v1872_v2 }
 0x141   :  { %v917_v10 = vmul.f32 %v905_v15, %v1774_v35  ;;  %v324_v5 = vmul.f32 %v312_v19, %v1819_v55  ;;  %v1894_v57 = vand.u32 2147483647, %v1148_v8  ;;  %vm1011_vm14 = vcmp.eq.f32.partialorder %v1808_v36, 0.0 }
 0x142   :  { %v515_v56 = vmul.f32 %v467_v11, %v407_v58  ;;  %v822_v54 = vmul.f32 %v810_v27, %v1859_v33  ;;  %v1012_v24 = vand.u32 2147483648, %v1808_v36  ;;  %vm1900_vm15 = vcmp.lt.f32.partialorder %v1174_v60, 0.0 }
 0x143   :  { %v929_v61 = vadd.f32 -0.2145988, %v917_v10  ;;  %v336_v39 = vadd.f32 -0.050174303, %v324_v5  ;;  %v1256_v63 = vpop.eup %1255  ;;  %v253_v21 = vmul.f32 -0.0012624911, %v1894_v57  ;;  %v1010_v25 = vsel %vm1009_vm13, %v1808_v36, %v1008_v53 }
 0x144   :  { %v539_v43 = vsub.f32 3.1415927, %v515_v56  ;;  %v834_v30 = vadd.f32 -0.017088126, %v822_v54  ;;  %v1911_v0 = vsub.f32 1.0, %v1894_v57  ;;  %v469_v7 = vmul.f32 %v1256_v63, %v1837_v38 }
 0x145   :  { %v941_v51 = vmul.f32 %v929_v61, %v1774_v35  ;;  %v348_v3 = vmul.f32 %v336_v39, %v1819_v55  ;;  %v265_v32 = vadd.f32 0.00667009, %v253_v21  ;;  %v1918_v12 = vand.u32 2147483647, %v1176_v18 }
 0x146   :  { %v551_v46 = vsel %vm1881_vm12, %v539_v43, %v515_v56  ;;  %v846_v60 = vmul.f32 %v834_v30, %v1859_v33  ;;  %v1013_v29 = vsel %vm1011_vm14, %v1012_v24, %v1010_v25  ;;  %v1926_v47 = vmul.f32 %v1403_v48, %v1488_v37 }
 0x147   :  { %v563_v35 = vsub.f32 0.0, %v551_v46  ;;  %v953_v6 = vadd.f32 1.5707963, %v941_v51  ;;  %v360_v1 = vadd.f32 0.08897899, %v348_v3  ;;  %v277_v42 = vmul.f32 %v265_v32, %v1894_v57 }
 0x148   :  { %v858_v23 = vadd.f32 0.03089188, %v846_v60  ;;  %vm470_vm0 = vcmp.eq.f32.partialorder %v1837_v38, inf  ;;  %v799_v16 = vmul.f32 -0.0012624911, %v1918_v12  ;;  %vm472_vm1 = vcmp.eq.f32.partialorder %v1837_v38, 0.0 }
 0x149   :  { %575 = vst [vmem:[%s2276_s2 + $0x28] sm:$0xff] %v563_v35  ;;  %v1061_v9 = vmul.f32 %v1013_v29, %v953_v6  ;;  %v372_v13 = vmul.f32 %v360_v1, %v1819_v55  ;;  %v289_v34 = vadd.f32 -0.017088126, %v277_v42  ;;  %1259 = vrsqrt.f32 %v1911_v0 }
 0x14a   :  { %v870_v36 = vmul.f32 %v858_v23, %v1859_v33  ;;  %v471_v19 = vsel %vm470_vm0, %v1837_v38, %v469_v7  ;;  %v811_v58 = vadd.f32 0.00667009, %v799_v16  ;;  %v1258_v11 = vpop.eup %1257  ;;  %v1940_v53 = vsub.f32 1.0, %v1918_v12 }
 0x14b   :  { %v1085_v37 = vsub.f32 3.1415927, %v1061_v9  ;;  %v384_v15 = vadd.f32 -0.2145988, %v372_v13  ;;  %v301_v10 = vmul.f32 %v289_v34, %v1894_v57  ;;  %v1149_v5 = vclamps-f32 %v1926_v47, 0.99999 }
 0x14c   :  { %v882_v27 = vadd.f32 -0.050174303, %v870_v36  ;;  %v473_v61 = vand.u32 2147483648, %v1837_v38  ;;  %v823_v24 = vmul.f32 %v811_v58, %v1918_v12  ;;  %v1951_v30 = vmul.f32 %v1407_v50, %v1499_v44 }
 0x14d   :  { %v1097_v56 = vsel %vm1900_vm15, %v1085_v37, %v1061_v9  ;;  %v396_v54 = vmul.f32 %v384_v15, %v1819_v55  ;;  %v313_v43 = vadd.f32 0.03089188, %v301_v10  ;;  %v1015_v22 = vmul.f32 %v1258_v11, %v1872_v2 }
 0x14e   :  { %v1109_v39 = vsub.f32 0.0, %v1097_v56  ;;  %v894_v63 = vmul.f32 %v882_v27, %v1859_v33  ;;  %v474_v51 = vsel %vm472_vm1, %v473_v61, %v471_v19  ;;  %v835_v25 = vadd.f32 -0.017088126, %v823_v24 }
 0x14f   :  { %v408_v21 = vadd.f32 1.5707963, %v396_v54  ;;  %v325_v3 = vmul.f32 %v313_v43, %v1894_v57  ;;  %1261 = vrsqrt.f32 %v1940_v53  ;;  %v1963_v44 = vand.u32 2147483647, %v1149_v5 }
 0x150   :  { %1186 = vst [vmem:[%s2276_s2 + $0x88] sm:$0xff] %v1109_v39  ;;  %v906_v55 = vadd.f32 0.08897899, %v894_v63  ;;  %vm1967_vm2 = vcmp.lt.f32.partialorder %v1147_v41, 0.0  ;;  %vm1016_vm3 = vcmp.eq.f32.partialorder %v1872_v2, inf  ;;  %v847_v60 = vmul.f32 %v835_v25, %v1918_v12 }
 0x151   :  { %v516_v46 = vmul.f32 %v474_v51, %v408_v21  ;;  %vm1018_vm4 = vcmp.eq.f32.partialorder %v1872_v2, 0.0  ;;  %v337_v35 = vadd.f32 -0.050174303, %v325_v3  ;;  %v254_v6 = vmul.f32 -0.0012624911, %v1963_v44 }
 0x152   :  { %v918_v32 = vmul.f32 %v906_v55, %v1859_v33  ;;  %v1017_v7 = vsel %vm1016_vm3, %v1872_v2, %v1015_v22  ;;  %v1019_v28 = vand.u32 2147483648, %v1872_v2  ;;  %v859_v41 = vadd.f32 0.03089188, %v847_v60 }
 0x153   :  { %v540_v1 = vsub.f32 3.1415927, %v516_v46  ;;  %v1260_v29 = vpop.eup %1259  ;;  %v349_v42 = vmul.f32 %v337_v35, %v1894_v57  ;;  %v266_v9 = vadd.f32 0.00667009, %v254_v6  ;;  %v1177_v13 = vclamps-f32 %v1951_v30, 0.99999 }
 0x154   :  { %v930_v23 = vadd.f32 -0.2145988, %v918_v32  ;;  %vm1984_vm5 = vcmp.lt.f32.partialorder %v1175_v62, 0.0  ;;  %v871_v34 = vmul.f32 %v859_v41, %v1918_v12  ;;  %v1990_v37 = vsub.f32 1.0, %v1963_v44 }
 0x155   :  { %v552_v16 = vsel %vm1967_vm2, %v540_v1, %v516_v46  ;;  %v1994_v15 = vmul.f32 %v1405_v49, %v1491_v40  ;;  %v361_v11 = vadd.f32 0.08897899, %v349_v42  ;;  %v278_v27 = vmul.f32 %v266_v9, %v1963_v44 }
 0x156   :  { %v564_v19 = vsub.f32 0.0, %v552_v16  ;;  %v942_v58 = vmul.f32 %v930_v23, %v1859_v33  ;;  %v476_v59 = vmul.f32 %v1260_v29, %v1911_v0  ;;  %vm477_vm6 = vcmp.eq.f32.partialorder %v1911_v0, inf }
 0x157   :  { %vm479_vm7 = vcmp.eq.f32.partialorder %v1911_v0, 0.0  ;;  %v883_v62 = vadd.f32 -0.050174303, %v871_v34  ;;  %v1020_v40 = vsel %vm1018_vm4, %v1019_v28, %v1017_v7  ;;  %v373_v33 = vmul.f32 %v361_v11, %v1894_v57 }
 0x158   :  { %576 = vst [vmem:[%s2276_s2 + $0x30] sm:$0xff] %v564_v19  ;;  %v954_v10 = vadd.f32 1.5707963, %v942_v58  ;;  %v290_v56 = vadd.f32 -0.017088126, %v278_v27  ;;  %1263 = vrsqrt.f32 %v1990_v37  ;;  %v480_v21 = vand.u32 2147483648, %v1911_v0 }
 0x159   :  { %v895_v54 = vmul.f32 %v883_v62, %v1918_v12  ;;  %v2011_v61 = vand.u32 2147483647, %v1177_v13  ;;  %v1150_v24 = vclamps-f32 %v1994_v15, 0.99999  ;;  %v1262_v39 = vpop.eup %1261  ;;  %v385_v43 = vadd.f32 -0.2145988, %v373_v33 }
 0x15a   :  { %v1062_v63 = vmul.f32 %v1020_v40, %v954_v10  ;;  %v302_v2 = vmul.f32 %v290_v56, %v1963_v44  ;;  %v478_v51 = vsel %vm477_vm6, %v1911_v0, %v476_v59  ;;  %v1022_v35 = vmul.f32 %v1262_v39, %v1940_v53 }
 0x15b   :  { %v907_v22 = vadd.f32 0.08897899, %v895_v54  ;;  %v800_v25 = vmul.f32 -0.0012624911, %v2011_v61  ;;  %v2021_v55 = vsub.f32 1.0, %v2011_v61  ;;  %v397_v46 = vmul.f32 %v385_v43, %v1894_v57 }
 0x15c   :  { %v1086_v3 = vsub.f32 3.1415927, %v1062_v63  ;;  %v314_v38 = vadd.f32 0.03089188, %v302_v2  ;;  %v2026_v60 = vand.u32 2147483647, %v1150_v24  ;;  %v481_v28 = vsel %vm479_vm7, %v480_v21, %v478_v51 }
 0x15d   :  { %v919_v32 = vmul.f32 %v907_v22, %v1918_v12  ;;  %vm1023_vm8 = vcmp.eq.f32.partialorder %v1940_v53, inf  ;;  %v812_v6 = vadd.f32 0.00667009, %v800_v25  ;;  %v409_v7 = vadd.f32 1.5707963, %v397_v46 }
 0x15e   :  { %v1098_v1 = vsel %vm1984_vm5, %v1086_v3, %v1062_v63  ;;  %v326_v57 = vmul.f32 %v314_v38, %v1963_v44  ;;  %1265 = vrsqrt.f32 %v2021_v55  ;;  %v1026_v9 = vand.u32 2147483648, %v1940_v53 }
 0x15f   :  { %v1110_v41 = vsub.f32 0.0, %v1098_v1  ;;  %v931_v29 = vadd.f32 -0.2145988, %v919_v32  ;;  %v824_v23 = vmul.f32 %v812_v6, %v2011_v61  ;;  %v517_v42 = vmul.f32 %v481_v28, %v409_v7 }
 0x160   :  { %v338_v16 = vadd.f32 -0.050174303, %v326_v57  ;;  %v255_v34 = vmul.f32 -0.0012624911, %v2026_v60  ;;  %v1024_v36 = vsel %vm1023_vm8, %v1940_v53, %v1022_v35  ;;  %v2048_v58 = vsub.f32 1.0, %v2026_v60 }
 0x161   :  { %1187 = vst [vmem:[%s2276_s2 + $0x90] sm:$0xff] %v1110_v41  ;;  %v943_v0 = vmul.f32 %v931_v29, %v1918_v12  ;;  %v836_v19 = vadd.f32 -0.017088126, %v824_v23  ;;  %v541_v11 = vsub.f32 3.1415927, %v517_v42  ;;  %v2053_v62 = vmul.f32 %v1409_v52, %v1513_v14 }
 0x162   :  { %v350_v27 = vmul.f32 %v338_v16, %v1963_v44  ;;  %v267_v59 = vadd.f32 0.00667009, %v255_v34  ;;  %v1264_v10 = vpop.eup %1263  ;;  %vm529_vm9 = vcmp.lt.f32.partialorder %v1148_v8, 0.0  ;;  %vm1025_vm10 = vcmp.eq.f32.partialorder %v1940_v53, 0.0 }
 0x163   :  { %v955_v12 = vadd.f32 1.5707963, %v943_v0  ;;  %v848_v40 = vmul.f32 %v836_v19, %v2011_v61  ;;  %v553_v33 = vsel %vm529_vm9, %v541_v11, %v517_v42  ;;  %v1027_v56 = vsel %vm1025_vm10, %v1026_v9, %v1024_v36 }
 0x164   :  { %v362_v54 = vadd.f32 0.08897899, %v350_v27  ;;  %v279_v39 = vmul.f32 %v267_v59, %v2026_v60  ;;  %v565_v63 = vsub.f32 0.0, %v553_v33  ;;  %1267 = vrsqrt.f32 %v2048_v58 }
 0x165   :  { %v1063_v43 = vmul.f32 %v1027_v56, %v955_v12  ;;  %v860_v21 = vadd.f32 0.03089188, %v848_v40  ;;  %v483_v45 = vmul.f32 %v1264_v10, %v1990_v37  ;;  %v1178_v2 = vclamps-f32 %v2053_v62, 0.99999 }
 0x166   :  { %v374_v14 = vmul.f32 %v362_v54, %v1963_v44  ;;  %v291_v8 = vadd.f32 -0.017088126, %v279_v39  ;;  %577 = vst [vmem:[%s2276_s2 + $0x38] sm:$0xff] %v565_v63  ;;  %v2070_v22 = vmul.f32 %v1403_v48, %v1520_v17  ;;  %vm1075_vm11 = vcmp.lt.f32.partialorder %v1176_v18, 0.0 }
 0x167   :  { %v1087_v53 = vsub.f32 3.1415927, %v1063_v43  ;;  %v872_v51 = vmul.f32 %v860_v21, %v2011_v61  ;;  %v2077_v46 = vand.u32 2147483647, %v1178_v2  ;;  %vm484_vm12 = vcmp.eq.f32.partialorder %v1990_v37, inf }
 0x168   :  { %v386_v25 = vadd.f32 -0.2145988, %v374_v14  ;;  %v303_v3 = vmul.f32 %v291_v8, %v2026_v60  ;;  %v1266_v38 = vpop.eup %1265  ;;  %v1151_v6 = vclamps-f32 %v2070_v22, 0.99999  ;;  %v485_v17 = vsel %vm484_vm12, %v1990_v37, %v483_v45 }
 0x169   :  { %v1099_v32 = vsel %vm1075_vm11, %v1087_v53, %v1063_v43  ;;  %v884_v35 = vadd.f32 -0.050174303, %v872_v51  ;;  %vm486_vm13 = vcmp.eq.f32.partialorder %v1990_v37, 0.0  ;;  %v487_v18 = vand.u32 2147483648, %v1990_v37 }
 0x16a   :  { %v1111_v1 = vsub.f32 0.0, %v1099_v32  ;;  %v398_v48 = vmul.f32 %v386_v25, %v1963_v44  ;;  %v315_v26 = vadd.f32 0.03089188, %v303_v3  ;;  %v801_v28 = vmul.f32 -0.0012624911, %v2077_v46 }
 0x16b   :  { %v896_v7 = vmul.f32 %v884_v35, %v2011_v61  ;;  %v1029_v41 = vmul.f32 %v1266_v38, %v2021_v55  ;;  %v2094_v29 = vand.u32 2147483647, %v1151_v6  ;;  %v488_v23 = vsel %vm486_vm13, %v487_v18, %v485_v17 }
 0x16c   :  { %1188 = vst [vmem:[%s2276_s2 + $0x98] sm:$0xff] %v1111_v1  ;;  %v410_v57 = vadd.f32 1.5707963, %v398_v48  ;;  %v327_v44 = vmul.f32 %v315_v26, %v2026_v60  ;;  %v813_v37 = vadd.f32 0.00667009, %v801_v28  ;;  %v2097_v9 = vsub.f32 1.0, %v2077_v46 }
 0x16d   :  { %v908_v42 = vadd.f32 0.08897899, %v896_v7  ;;  %vm2101_vm14 = vcmp.lt.f32.partialorder %v1149_v5, 0.0  ;;  %vm1030_vm15 = vcmp.eq.f32.partialorder %v2021_v55, inf  ;;  %v1033_v11 = vand.u32 2147483648, %v2021_v55 }
 0x16e   :  { %v518_v16 = vmul.f32 %v488_v23, %v410_v57  ;;  %v339_v0 = vadd.f32 -0.050174303, %v327_v44  ;;  %v1268_v36 = vpop.eup %1267  ;;  %v825_v27 = vmul.f32 %v813_v37, %v2077_v46  ;;  %v256_v59 = vmul.f32 -0.0012624911, %v2094_v29 }
 0x16f   :  { %v920_v19 = vmul.f32 %v908_v42, %v2011_v61  ;;  %v1031_v12 = vsel %vm1030_vm15, %v2021_v55, %v1029_v41  ;;  %v2114_v5 = vmul.f32 %v1407_v50, %v1522_v20  ;;  %1269 = vrsqrt.f32 %v2097_v9 }
 0x170   :  { %v542_v10 = vsub.f32 3.1415927, %v518_v16  ;;  %v351_v47 = vmul.f32 %v339_v0, %v2026_v60  ;;  %v837_v33 = vadd.f32 -0.017088126, %v825_v27  ;;  %v268_v56 = vadd.f32 0.00667009, %v256_v59 }
 0x171   :  { %v932_v40 = vadd.f32 -0.2145988, %v920_v19  ;;  %vm2121_vm0 = vcmp.lt.f32.partialorder %v1177_v13, 0.0  ;;  %v490_v43 = vmul.f32 %v1268_v36, %v2048_v58  ;;  %v2127_v50 = vsub.f32 1.0, %v2094_v29 }
 0x172   :  { %v554_v54 = vsel %vm2101_vm14, %v542_v10, %v518_v16  ;;  %v363_v63 = vadd.f32 0.08897899, %v351_v47  ;;  %v849_v14 = vmul.f32 %v837_v33, %v2077_v46  ;;  %v280_v45 = vmul.f32 %v268_v56, %v2094_v29 }
 0x173   :  { %v566_v20 = vsub.f32 0.0, %v554_v54  ;;  %v944_v21 = vmul.f32 %v932_v40, %v2011_v61  ;;  %vm1032_vm1 = vcmp.eq.f32.partialorder %v2021_v55, 0.0  ;;  %vm491_vm2 = vcmp.eq.f32.partialorder %v2048_v58, inf }
 0x174   :  { %v375_v30 = vmul.f32 %v363_v63, %v2026_v60  ;;  %v1179_v13 = vclamps-f32 %v2114_v5, 0.99999  ;;  %v1034_v53 = vsel %vm1032_vm1, %v1033_v11, %v1031_v12  ;;  %v861_v51 = vadd.f32 0.03089188, %v849_v14 }
 0x175   :  { %578 = vst [vmem:[%s2276_s2 + $0x40] sm:$0xff] %v566_v20  ;;  %v956_v8 = vadd.f32 1.5707963, %v944_v21  ;;  %v292_v61 = vadd.f32 -0.017088126, %v280_v45  ;;  %v492_v3 = vsel %vm491_vm2, %v2048_v58, %v490_v43  ;;  %1271 = vrsqrt.f32 %v2127_v50 }
 0x176   :  { %v387_v25 = vadd.f32 -0.2145988, %v375_v30  ;;  %v2143_v55 = vand.u32 2147483647, %v1179_v13  ;;  %v873_v32 = vmul.f32 %v861_v51, %v2077_v46  ;;  %v2149_v1 = vmul.f32 %v1405_v49, %v1527_v31 }
 0x177   :  { %v1064_v38 = vmul.f32 %v1034_v53, %v956_v8  ;;  %v304_v35 = vmul.f32 %v292_v61, %v2094_v29  ;;  %vm493_vm3 = vcmp.eq.f32.partialorder %v2048_v58, 0.0  ;;  %v494_v17 = vand.u32 2147483648, %v2048_v58 }
 0x178   :  { %v399_v48 = vmul.f32 %v387_v25, %v2026_v60  ;;  %v802_v26 = vmul.f32 -0.0012624911, %v2143_v55  ;;  %v885_v7 = vadd.f32 -0.050174303, %v873_v32  ;;  %v2156_v23 = vsub.f32 1.0, %v2143_v55 }
 0x179   :  { %v1088_v18 = vsub.f32 3.1415927, %v1064_v38  ;;  %v316_v28 = vadd.f32 0.03089188, %v304_v35  ;;  %v495_v41 = vsel %vm493_vm3, %v494_v17, %v492_v3  ;;  %v1270_v42 = vpop.eup %1269  ;;  %v1152_v58 = vclamps-f32 %v2149_v1, 0.99999 }
 0x17a   :  { %v411_v57 = vadd.f32 1.5707963, %v399_v48  ;;  %v814_v44 = vadd.f32 0.00667009, %v802_v26  ;;  %v897_v31 = vmul.f32 %v885_v7, %v2077_v46  ;;  %v2166_v0 = vmul.f32 %v1409_v52, %v1555_v4 }
 0x17b   :  { %v1100_v49 = vsel %vm2121_vm0, %v1088_v18, %v1064_v38  ;;  %v328_v60 = vmul.f32 %v316_v28, %v2094_v29  ;;  %vm531_vm4 = vcmp.lt.f32.partialorder %v1150_v24, 0.0  ;;  %vm1037_vm5 = vcmp.eq.f32.partialorder %v2097_v9, inf }
 0x17c   :  { %v1112_v37 = vsub.f32 0.0, %v1100_v49  ;;  %v519_v16 = vmul.f32 %v495_v41, %v411_v57  ;;  %v826_v34 = vmul.f32 %v814_v44, %v2143_v55  ;;  %v909_v36 = vadd.f32 0.08897899, %v897_v31 }
 0x17d   :  { %v340_v19 = vadd.f32 -0.050174303, %v328_v60  ;;  %1273 = vrsqrt.f32 %v2156_v23  ;;  %v1036_v52 = vmul.f32 %v1270_v42, %v2097_v9  ;;  %v2180_v15 = vand.u32 2147483647, %v1152_v58 }
 0x17e   :  { %1189 = vst [vmem:[%s2276_s2 + $0xa0] sm:$0xff] %v1112_v37  ;;  %v543_v11 = vsub.f32 3.1415927, %v519_v16  ;;  %v838_v27 = vadd.f32 -0.017088126, %v826_v34  ;;  %v921_v59 = vmul.f32 %v909_v36, %v2077_v46  ;;  %vm1039_vm6 = vcmp.eq.f32.partialorder %v2097_v9, 0.0 }
 0x17f   :  { %v352_v4 = vmul.f32 %v340_v19, %v2094_v29  ;;  %v1272_v24 = vpop.eup %1271  ;;  %v1180_v47 = vclamps-f32 %v2166_v0, 0.99999  ;;  %v1040_v56 = vand.u32 2147483648, %v2097_v9  ;;  %v257_v63 = vmul.f32 -0.0012624911, %v2180_v15 }
 0x180   :  { %v555_v10 = vsel %vm531_vm4, %v543_v11, %v519_v16  ;;  %v850_v12 = vmul.f32 %v838_v27, %v2143_v55  ;;  %v933_v33 = vadd.f32 -0.2145988, %v921_v59  ;;  %v1038_v21 = vsel %vm1037_vm5, %v2097_v9, %v1036_v52 }
 0x181   :  { %v567_v40 = vsub.f32 0.0, %v555_v10  ;;  %v364_v54 = vadd.f32 0.08897899, %v352_v4  ;;  %v2189_v43 = vand.u32 2147483647, %v1180_v47  ;;  %v497_v45 = vmul.f32 %v1272_v24, %v2127_v50 }
 0x182   :  { %v862_v39 = vadd.f32 0.03089188, %v850_v12  ;;  %v945_v20 = vmul.f32 %v933_v33, %v2077_v46  ;;  %vm498_vm7 = vcmp.eq.f32.partialorder %v2127_v50, inf  ;;  %v269_v8 = vadd.f32 0.00667009, %v257_v63 }
 0x183   :  { %579 = vst [vmem:[%s2276_s2 + $0x48] sm:$0xff] %v567_v40  ;;  %v376_v14 = vmul.f32 %v364_v54, %v2094_v29  ;;  %v2203_v53 = vsub.f32 1.0, %v2180_v15  ;;  %v803_v46 = vmul.f32 -0.0012624911, %v2189_v43  ;;  %v1041_v25 = vsel %vm1039_vm6, %v1040_v56, %v1038_v21 }
 0x184   :  { %v874_v30 = vmul.f32 %v862_v39, %v2143_v55  ;;  %v957_v51 = vadd.f32 1.5707963, %v945_v20  ;;  %vm500_vm8 = vcmp.eq.f32.partialorder %v2127_v50, 0.0  ;;  %v281_v38 = vmul.f32 %v269_v8, %v2180_v15 }
 0x185   :  { %v388_v61 = vadd.f32 -0.2145988, %v376_v14  ;;  %v499_v48 = vsel %vm498_vm7, %v2127_v50, %v497_v45  ;;  %v815_v17 = vadd.f32 0.00667009, %v803_v46  ;;  %v501_v18 = vand.u32 2147483648, %v2127_v50 }
 0x186   :  { %v886_v3 = vadd.f32 -0.050174303, %v874_v30  ;;  %v1065_v32 = vmul.f32 %v1041_v25, %v957_v51  ;;  %v293_v28 = vadd.f32 -0.017088126, %v281_v38  ;;  %v2215_v9 = vsub.f32 1.0, %v2189_v43 }
 0x187   :  { %v400_v35 = vmul.f32 %v388_v61, %v2094_v29  ;;  %v1274_v26 = vpop.eup %1273  ;;  %1275 = vrsqrt.f32 %v2203_v53  ;;  %v827_v44 = vmul.f32 %v815_v17, %v2189_v43  ;;  %vm1077_vm9 = vcmp.lt.f32.partialorder %v1178_v2, 0.0 }
 0x188   :  { %v898_v7 = vmul.f32 %v886_v3, %v2143_v55  ;;  %v1089_v57 = vsub.f32 3.1415927, %v1065_v32  ;;  %v502_v29 = vsel %vm500_vm8, %v501_v18, %v499_v48  ;;  %v305_v49 = vmul.f32 %v293_v28, %v2180_v15 }
 0x189   :  { %v412_v41 = vadd.f32 1.5707963, %v400_v35  ;;  %v1043_v37 = vmul.f32 %v1274_v26, %v2156_v23  ;;  %v839_v16 = vadd.f32 -0.017088126, %v827_v44  ;;  %1277 = vrsqrt.f32 %v2215_v9 }
 0x18a   :  { %v910_v42 = vadd.f32 0.08897899, %v898_v7  ;;  %v1101_v31 = vsel %vm1077_vm9, %v1089_v57, %v1065_v32  ;;  %v317_v19 = vadd.f32 0.03089188, %v305_v49  ;;  %vm532_vm10 = vcmp.lt.f32.partialorder %v1151_v6, 0.0 }
 0x18b   :  { %v520_v60 = vmul.f32 %v502_v29, %v412_v41  ;;  %v1113_v34 = vsub.f32 0.0, %v1101_v31  ;;  %v851_v62 = vmul.f32 %v839_v16, %v2189_v43  ;;  %vm1044_vm11 = vcmp.eq.f32.partialorder %v2156_v23, inf }
 0x18c   :  { %v922_v36 = vmul.f32 %v910_v42, %v2143_v55  ;;  %v329_v50 = vmul.f32 %v317_v19, %v2180_v15  ;;  %v1045_v24 = vsel %vm1044_vm11, %v2156_v23, %v1043_v37  ;;  %v1047_v12 = vand.u32 2147483648, %v2156_v23 }
 0x18d   :  { %v544_v11 = vsub.f32 3.1415927, %v520_v60  ;;  %1190 = vst [vmem:[%s2276_s2 + $0xa8] sm:$0xff] %v1113_v34  ;;  %v863_v59 = vadd.f32 0.03089188, %v851_v62  ;;  %vm1046_vm12 = vcmp.eq.f32.partialorder %v2156_v23, 0.0 }
 0x18e   :  { %v934_v2 = vadd.f32 -0.2145988, %v922_v36  ;;  %v341_v10 = vadd.f32 -0.050174303, %v329_v50  ;;  %v1048_v56 = vsel %vm1046_vm12, %v1047_v12, %v1045_v24  ;;  %vm1078_vm13 = vcmp.lt.f32.partialorder %v1179_v13, 0.0 }
 0x18f   :  { %v556_v27 = vsel %vm532_vm10, %v544_v11, %v520_v60  ;;  %v875_v40 = vmul.f32 %v863_v59, %v2189_v43  ;;  %vm505_vm14 = vcmp.eq.f32.partialorder %v2203_v53, inf  ;;  %v508_v5 = vand.u32 2147483648, %v2203_v53 }
 0x190   :  { %v568_v52 = vsub.f32 0.0, %v556_v27  ;;  %v946_v4 = vmul.f32 %v934_v2, %v2143_v55  ;;  %v353_v6 = vmul.f32 %v341_v10, %v2180_v15  ;;  %vm507_vm15 = vcmp.eq.f32.partialorder %v2203_v53, 0.0 }
 0x191   :  { %v1276_v33 = vpop.eup %1275  ;;  %v887_v54 = vadd.f32 -0.050174303, %v875_v40  ;;  %vm1051_vm0 = vcmp.eq.f32.partialorder %v2215_v9, inf  ;;  %v1054_v17 = vand.u32 2147483648, %v2215_v9  ;;  %vm1053_vm1 = vcmp.eq.f32.partialorder %v2215_v9, 0.0 }
 0x192   :  { %580 = vst [vmem:[%s2276_s2 + $0x50] sm:$0xf] %v568_v52  ;;  %v958_v22 = vadd.f32 1.5707963, %v946_v4  ;;  %v365_v39 = vadd.f32 0.08897899, %v353_v6  ;;  %v504_v45 = vmul.f32 %v1276_v33, %v2203_v53 }
 0x193   :  { %v899_v63 = vmul.f32 %v887_v54, %v2189_v43  ;;  %v1278_v20 = vpop.eup %1277  ;;  %vm533_vm2 = vcmp.lt.f32.partialorder %v1152_v58, 0.0  ;;  %vm1079_vm3 = vcmp.lt.f32.partialorder %v1180_v47, 0.0 }
 0x194   :  { %v1066_v55 = vmul.f32 %v1048_v56, %v958_v22  ;;  %v377_v14 = vmul.f32 %v365_v39, %v2180_v15  ;;  %v1050_v46 = vmul.f32 %v1278_v20, %v2215_v9  ;;  %v506_v3 = vsel %vm505_vm14, %v2203_v53, %v504_v45 }
 0x195   :  { %v911_v30 = vadd.f32 0.08897899, %v899_v63  ;;  %v509_v32 = vsel %vm507_vm15, %v508_v5, %v506_v3 }
 0x196   :  { %v1090_v21 = vsub.f32 3.1415927, %v1066_v55  ;;  %v389_v8 = vadd.f32 -0.2145988, %v377_v14  ;;  %v1052_v48 = vsel %vm1051_vm0, %v2215_v9, %v1050_v46 }
 0x197   :  { %v923_v61 = vmul.f32 %v911_v30, %v2189_v43  ;;  %v1055_v7 = vsel %vm1053_vm1, %v1054_v17, %v1052_v48 }
 0x198   :  { %v1102_v23 = vsel %vm1078_vm13, %v1090_v21, %v1066_v55  ;;  %v401_v25 = vmul.f32 %v389_v8, %v2180_v15 }
 0x199   :  { %v1114_v51 = vsub.f32 0.0, %v1102_v23  ;;  %v935_v13 = vadd.f32 -0.2145988, %v923_v61 }
 0x19a   :  { %v413_v38 = vadd.f32 1.5707963, %v401_v25 }
 0x19b   :  { %1191 = vst [vmem:[%s2276_s2 + $0xb0] sm:$0xf] %v1114_v51  ;;  %v947_v35 = vmul.f32 %v935_v13, %v2189_v43 }
 0x19c   :  { %v521_v15 = vmul.f32 %v509_v32, %v413_v38 }
 0x19d   :  { %v959_v26 = vadd.f32 1.5707963, %v947_v35 }
 0x19e   :  { %v545_v18 = vsub.f32 3.1415927, %v521_v15 }
 0x19f   :  { %v1067_v28 = vmul.f32 %v1055_v7, %v959_v26 }
 0x1a0   :  { %v557_v53 = vsel %vm533_vm2, %v545_v18, %v521_v15 }
 0x1a1   :  { %v569_v57 = vsub.f32 0.0, %v557_v53  ;;  %v1091_v41 = vsub.f32 3.1415927, %v1067_v28 }
 0x1a3   :  { %581 = vst [vmem:[%s2276_s2 + $0x58] sm:$0xf] %v569_v57  ;;  %v1103_v43 = vsel %vm1079_vm3, %v1091_v41, %v1067_v28 }
 0x1a4   :  { %v1115_v44 = vsub.f32 0.0, %v1103_v43 }
 0x1a6   :  { %1192 = vst [vmem:[%s2276_s2 + $0xb8] sm:$0xf] %v1115_v44 }

</bundles_post_ra>
